<compile_context>
chip_gen: v7x
topology: tpu7x:2x2x1
jax: 0.10.0
libtpu: 0.0.40
codegen_flags: <defaults>
</compile_context>

<pallas_src>
import functools

import jax
import jax.numpy as jnp
from jax.experimental import pallas as pl
from jax.experimental.pallas import tpu as pltpu


def _fused_forward_kernel(*refs, block_cfgs, bt_lane):
    """Entire BacalhauNetV1 forward for one batch tile (VMEM-resident).

    refs layout (positional):
      x_ref                                  (bt_sub, L0, bt_lane*C0)
      per block i: wdw (K, lw_in)            depthwise weight, BN scale folded
                   dw_shift (1, lw_in)       folded-BN shift (depthwise stage)
                   wpw (lw_in, lw_out) bf16  block-diagonal pointwise weight
                   pw_shift (1, lw_out)      folded-BN shift (pointwise stage)
      fc_w (lw_last, lw_cls) bf16, fc_b (1, lw_cls)
      o_ref                                  (bt_sub, lw_cls)
      per block i: pad_buf                   (bt_sub, l_pad_i, lw_in) scratch
    """
    nb = len(block_cfgs)
    x_ref = refs[0]
    idx = 1
    bparams = []
    for _ in range(nb):
        bparams.append(refs[idx:idx + 4])
        idx += 4
    fc_w_ref = refs[idx]
    fc_b_ref = refs[idx + 1]
    o_ref = refs[idx + 2]
    pad_bufs = refs[idx + 3: idx + 3 + nb]

    bt_sub = x_ref.shape[0]

    # QuantHardTanh(min=-2, max=3): clamp ONCE (hoisted out of all taps).
    cur = jnp.clip(x_ref[...].astype(jnp.float32), -2.0, 3.0)

    for i, (K, S, c_in, c_out, l_in, l_out, pad) in enumerate(block_cfgs):
        wdw_ref, dwsh_ref, wpw_ref, pwsh_ref = bparams[i]
        buf = pad_bufs[i]
        lw_in = bt_lane * c_in
        lw_out = bt_lane * c_out

        # In-kernel zero padding.  Halos are re-zeroed every step: zeroing
        # them only on program_id==0 is unsafe under megacore grid splitting
        # (the second core's private scratch never sees step 0).
        if pad > 0:
            zer = jnp.zeros((bt_sub, pad, lw_in), jnp.float32)
            buf[:, pl.ds(0, pad), :] = zer
            buf[:, pl.ds(pad + l_in, pad), :] = zer
        buf[:, pl.ds(pad, l_in), :] = cur

        # Depthwise 1D conv, unrolled over the static K taps.  BN scale is
        # already folded into wdw; the tap-weight load is hoisted (one vld).
        wdw_all = wdw_ref[...]                          # (K, lw_in) f32
        acc = jnp.zeros((bt_sub, l_out, lw_in), jnp.float32)
        for k in range(K):
            if S == 1:
                xk = buf[:, pl.ds(k, l_out), :]
            else:
                xk = buf[:, pl.ds(k, l_out, stride=S), :]
            acc = acc + xk * wdw_all[k:k + 1, :]
        dw = jnp.maximum(acc + dwsh_ref[...], 0.0)      # folded BN + ReLU

        # Pointwise 1x1 conv == block-diagonal channel matmul on the MXU.
        # Samples packed on sublanes (bt_sub*l_out rows) and lanes (bt_lane
        # channel groups) -> real MXU utilization.  bf16 operands, f32 acc.
        pw = jnp.dot(dw.reshape(bt_sub * l_out, lw_in).astype(jnp.bfloat16),
                     wpw_ref[...],
                     preferred_element_type=jnp.float32)
        pw = jnp.maximum(pw + pwsh_ref[...], 0.0)
        pw = pw.reshape(bt_sub, l_out, lw_out)

        # Residual: raw block input, added AFTER the pointwise ReLU
        # (matches `y += x` in DepthwiseSeparableConv.forward).
        if S == 1 and c_in == c_out:
            pw = pw + cur
        cur = pw

    # Global max-pool over time + flatten + (dropout p=0 skipped) + FC.
    m = jnp.max(cur, axis=1)                            # (bt_sub, lw_last)
    o_ref[...] = (jnp.dot(m.astype(jnp.bfloat16), fc_w_ref[...],
                          preferred_element_type=jnp.float32)
                  + fc_b_ref[...])


def _block_diag(w, n):
    """Tile a (ci, co) weight into an (n*ci, n*co) block-diagonal matrix."""
    ci, co = w.shape
    bd = jnp.zeros((n * ci, n * co), w.dtype)
    for j in range(n):
        bd = bd.at[j * ci:(j + 1) * ci, j * co:(j + 1) * co].set(w)
    return bd


def bacalhaunet_forward(x_ncl, params, layer_cfgs, num_classes, *,
                        bt_sub=8, bt_lane=None):
    """x_ncl: (B, C_in, L) float32 (PyTorch NCL layout)."""
    x = jnp.transpose(x_ncl, (0, 2, 1)).astype(jnp.float32)   # -> (B, L, C)
    B, L, C_in = x.shape

    # Static per-block geometry: (K, S, c_in, c_out, l_in, l_out, pad).
    block_cfgs = []
    c_cur, l_cur = C_in, L
    for (K, S, c_out) in layer_cfgs:
        pad = K // 2
        l_out = (l_cur + 2 * pad - K) // S + 1
        block_cfgs.append((K, S, c_cur, c_out, l_cur, l_out, pad))
        c_cur, l_cur = c_out, l_out
    c_last = c_cur

    # Lane-packing factor: the widest stage fills (up to) the 128-lane vreg.
    max_ch = max([C_in, num_classes] + [c for (_, _, c) in layer_cfgs])
    if bt_lane is None:
        bt_lane = max(1, 128 // max_ch)

    tile = bt_sub * bt_lane
    n_steps = -(-B // tile)
    b_pad = n_steps * tile
    if b_pad != B:
        x = jnp.concatenate(
            [x, jnp.zeros((b_pad - B, L, C_in), x.dtype)], axis=0)

    # Pack samples: bt_sub on the sublane-batch axis, bt_lane side-by-side on
    # the lane axis (layout plumbing outside the kernel, done once per call).
    xp = x.reshape(n_steps, bt_sub, bt_lane, L, C_in)
    xp = jnp.transpose(xp, (0, 1, 3, 2, 4)).reshape(
        n_steps, bt_sub, L, bt_lane * C_in)

    args = [xp]
    in_specs = [pl.BlockSpec((None, bt_sub, L, bt_lane * C_in),
                             lambda i: (i, 0, 0, 0))]
    for i, (K, S, ci, co, li, lo, pad) in enumerate(block_cfgs):
        p = params["blocks"][i]
        # Fold BN scales into conv weights (exact, pre-ReLU), tile depthwise
        # weights/shifts across lane-packed samples, build a block-diagonal
        # pointwise weight and pre-cast MXU operands to bf16.
        wdw = jnp.tile(p["wdw"] * p["dw_scale"], (1, bt_lane))
        dw_shift = jnp.tile(p["dw_shift"], (1, bt_lane))
        wpw = _block_diag(p["wpw"] * p["pw_scale"],
                          bt_lane).astype(jnp.bfloat16)
        pw_shift = jnp.tile(p["pw_shift"], (1, bt_lane))
        args += [wdw, dw_shift, wpw, pw_shift]
        lwi, lwo = bt_lane * ci, bt_lane * co
        in_specs += [
            pl.BlockSpec((K, lwi), lambda i: (0, 0)),
            pl.BlockSpec((1, lwi), lambda i: (0, 0)),
            pl.BlockSpec((lwi, lwo), lambda i: (0, 0)),
            pl.BlockSpec((1, lwo), lambda i: (0, 0)),
        ]
    fc_w = _block_diag(params["fc_w"], bt_lane).astype(jnp.bfloat16)
    fc_b = jnp.tile(params["fc_b"], (1, bt_lane))
    args += [fc_w, fc_b]
    lw_cls = bt_lane * num_classes
    in_specs += [pl.BlockSpec((bt_lane * c_last, lw_cls), lambda i: (0, 0)),
                 pl.BlockSpec((1, lw_cls), lambda i: (0, 0))]

    # One padded-activation scratch buffer per block.  For the demo shapes
    # this is a few hundred KiB; for very deep/long configs lower bt_sub or
    # raise vmem_limit_bytes in CompilerParams.
    scratch_shapes = [pltpu.VMEM((bt_sub, li + 2 * pad, bt_lane * ci),
                                 jnp.float32)
                      for (K, S, ci, co, li, lo, pad) in block_cfgs]

    kernel_fn = functools.partial(_fused_forward_kernel,
                                  block_cfgs=tuple(block_cfgs),
                                  bt_lane=bt_lane)

    out = pl.pallas_call(
        kernel_fn,
        out_shape=jax.ShapeDtypeStruct((n_steps, bt_sub, lw_cls), jnp.float32),
        grid=(n_steps,),
        in_specs=in_specs,
        out_specs=pl.BlockSpec((None, bt_sub, lw_cls), lambda i: (i, 0, 0)),
        scratch_shapes=scratch_shapes,
        compiler_params=pltpu.CompilerParams(
            dimension_semantics=("parallel",)),   # shard steps over TCs
    )(*args)

    # Unpack: (n_steps, bt_sub, bt_lane*ncls) -> (B, ncls).
    out = out.reshape(n_steps, bt_sub, bt_lane, num_classes)
    return out.reshape(b_pad, num_classes)[:B]


def reference_forward(x_ncl, params, layer_cfgs, num_classes):
    """Pure-JAX f32 reference mirroring the module semantics."""
    x = jnp.transpose(x_ncl, (0, 2, 1)).astype(jnp.float32)
    cur = jnp.clip(x, -2.0, 3.0)
    for bi, (K, S, c_out) in enumerate(layer_cfgs):
        p = params["blocks"][bi]
        pad = K // 2
        Bb, Ll, Cc = cur.shape
        xp = jnp.pad(cur, ((0, 0), (pad, pad), (0, 0)))
        l_out = (Ll + 2 * pad - K) // S + 1
        acc = jnp.zeros((Bb, l_out, Cc), jnp.float32)
        for k in range(K):
            acc = acc + xp[:, k:k + S * (l_out - 1) + 1:S, :] * p["wdw"][k]
        dw = jnp.maximum(acc * p["dw_scale"] + p["dw_shift"], 0.0)
        pw = jnp.einsum("blc,cd->bld", dw, p["wpw"])
        pw = jnp.maximum(pw * p["pw_scale"] + p["pw_shift"], 0.0)
        if S == 1 and Cc == c_out:
            pw = pw + cur
        cur = pw
    m = jnp.max(cur, axis=1)
    return m @ params["fc_w"] + params["fc_b"]


def init_params(key, in_channels, layer_cfgs, num_classes):
    """Deterministic synthetic parameters matching the module's shapes."""

    def bn_fold(k, c):
        k1, k2, k3, k4 = jax.random.split(k, 4)
        gamma = 1.0 + 0.1 * jax.random.normal(k1, (c,), jnp.float32)
        beta = 0.1 * jax.random.normal(k2, (c,), jnp.float32)
        mean = 0.1 * jax.random.normal(k3, (c,), jnp.float32)
        var = 1.0 + 0.1 * jax.random.uniform(k4, (c,), jnp.float32)
        scale = gamma / jnp.sqrt(var + 1e-5)
        shift = beta - mean * scale
        return scale.reshape(1, c), shift.reshape(1, c)

    blocks = []
    c_in = in_channels
    for (K, S, c_out) in layer_cfgs:
        key, k_wdw, k_bn1, k_wpw, k_bn2 = jax.random.split(key, 5)
        # Depthwise QuantConv1d weight: torch (C_in, 1, K) -> kernel (K, C_in)
        wdw = jax.random.normal(k_wdw, (K, c_in), jnp.float32) * (1.0 / K)
        dw_scale, dw_shift = bn_fold(k_bn1, c_in)
        # Pointwise QuantConv1d weight: torch (C_out, C_in, 1) -> (C_in, C_out)
        wpw = (jax.random.normal(k_wpw, (c_in, c_out), jnp.float32)
               * (1.0 / jnp.sqrt(float(c_in))))
        pw_scale, pw_shift = bn_fold(k_bn2, c_out)
        blocks.append(dict(wdw=wdw, dw_scale=dw_scale, dw_shift=dw_shift,
                           wpw=wpw, pw_scale=pw_scale, pw_shift=pw_shift))
        c_in = c_out

    key, k_fw, k_fb = jax.random.split(key, 3)
    # QuantLinear weight: torch (num_classes, C_last) -> (C_last, num_classes)
    fc_w = (jax.random.normal(k_fw, (c_in, num_classes), jnp.float32)
            * (1.0 / jnp.sqrt(float(c_in))))
    fc_b = 0.1 * jax.random.normal(k_fb, (1, num_classes), jnp.float32)
    return dict(blocks=blocks, fc_w=fc_w, fc_b=fc_b)


if __name__ == "__main__":
    key = jax.random.PRNGKey(0)
    # Small BacalhauNetConfig-equivalent:
    #   in_samples=64, in_channels=2, num_classes=8,
    #   layers = [(kernel=7, stride=2, out=8), (kernel=5, stride=1, out=8)]
    # (second block exercises the residual path: stride==1 and in==out)
    B, C_in, L = 96, 2, 64
    num_classes = 8
    layer_cfgs = [(7, 2, 8), (5, 1, 8)]

    k_x, k_p = jax.random.split(key)
    x = jax.random.normal(k_x, (B, C_in, L), jnp.float32)  # NCL, like PyTorch
    params = init_params(k_p, C_in, layer_cfgs, num_classes)

    # bt_sub=4, bt_lane auto (=16): 64 samples per grid step -> 2 grid steps.
    out = bacalhaunet_forward(x, params, layer_cfgs, num_classes, bt_sub=4)
    out = jax.block_until_ready(out)
    assert out.shape == (B, num_classes), out.shape

    # Loose-tolerance check vs. a pure-JAX f32 reference (kernel uses bf16
    # MXU operands, so exact bit-match is not expected).
    ref = reference_forward(x, params, layer_cfgs, num_classes)
    err = float(jnp.max(jnp.abs(out - ref)))
    scale = max(1.0, float(jnp.max(jnp.abs(ref))))
    assert err <= 0.05 * scale + 0.02, (err, scale)

    print("KERNEL_OK")
</pallas_src>

<mosaic_0001>
module attributes {stable_mosaic.version = 11 : i64} {
  func.func @_fused_forward_kernel(%arg0: i32, %arg1: memref<1x4x64x32xf32, #tpu.memory_space<vmem>>, %arg2: memref<7x32xf32, #tpu.memory_space<vmem>>, %arg3: memref<1x32xf32, #tpu.memory_space<vmem>>, %arg4: memref<32x128xbf16, #tpu.memory_space<vmem>>, %arg5: memref<1x128xf32, #tpu.memory_space<vmem>>, %arg6: memref<5x128xf32, #tpu.memory_space<vmem>>, %arg7: memref<1x128xf32, #tpu.memory_space<vmem>>, %arg8: memref<128x128xbf16, #tpu.memory_space<vmem>>, %arg9: memref<1x128xf32, #tpu.memory_space<vmem>>, %arg10: memref<128x128xbf16, #tpu.memory_space<vmem>>, %arg11: memref<1x128xf32, #tpu.memory_space<vmem>>, %arg12: memref<1x4x128xf32, #tpu.memory_space<vmem>>, %arg13: memref<4x70x32xf32, #tpu.memory_space<vmem>>, %arg14: memref<4x36x128xf32, #tpu.memory_space<vmem>>) attributes {dimension_semantics = [#tpu.dimension_semantics<parallel>], iteration_bounds = array<i64: 2>, scalar_prefetch = 0 : i64, scratch_operands = 2 : i64, tpu.core_type = #tpu.core_type<tc>, window_params = [{transform_indices = @transform_0, window_bounds = array<i64: 1, 4, 64, 32>}, {pipeline_mode = #tpu.pipeline_mode<synchronous>, transform_indices = @transform_1, window_bounds = array<i64: 7, 32>}, {pipeline_mode = #tpu.pipeline_mode<synchronous>, transform_indices = @transform_2, window_bounds = array<i64: 1, 32>}, {pipeline_mode = #tpu.pipeline_mode<synchronous>, transform_indices = @transform_3, window_bounds = array<i64: 32, 128>}, {pipeline_mode = #tpu.pipeline_mode<synchronous>, transform_indices = @transform_4, window_bounds = array<i64: 1, 128>}, {pipeline_mode = #tpu.pipeline_mode<synchronous>, transform_indices = @transform_5, window_bounds = array<i64: 5, 128>}, {pipeline_mode = #tpu.pipeline_mode<synchronous>, transform_indices = @transform_6, window_bounds = array<i64: 1, 128>}, {pipeline_mode = #tpu.pipeline_mode<synchronous>, transform_indices = @transform_7, window_bounds = array<i64: 128, 128>}, {pipeline_mode = #tpu.pipeline_mode<synchronous>, transform_indices = @transform_8, window_bounds = array<i64: 1, 128>}, {pipeline_mode = #tpu.pipeline_mode<synchronous>, transform_indices = @transform_9, window_bounds = array<i64: 128, 128>}, {pipeline_mode = #tpu.pipeline_mode<synchronous>, transform_indices = @transform_10, window_bounds = array<i64: 1, 128>}, {transform_indices = @transform_11, window_bounds = array<i64: 1, 4, 128>}]} {
    %c0 = arith.constant 0 : index
    %c0_0 = arith.constant 0 : index
    %c0_1 = arith.constant 0 : index
    %c0_2 = arith.constant 0 : index
    %0 = vector.load %arg1[%c0, %c0_0, %c0_1, %c0_2] : memref<1x4x64x32xf32, #tpu.memory_space<vmem>>, vector<1x4x64x32xf32>
    %1 = vector.shape_cast %0 : vector<1x4x64x32xf32> to vector<4x64x32xf32>
    %cst = arith.constant -2.000000e+00 : f32
    %cst_3 = arith.constant 3.000000e+00 : f32
    %2 = vector.broadcast %cst : f32 to vector<4x64x32xf32>
    %3 = arith.maximumf %2, %1 : vector<4x64x32xf32>
    %4 = vector.broadcast %cst_3 : f32 to vector<4x64x32xf32>
    %5 = arith.minimumf %4, %3 : vector<4x64x32xf32>
    %cst_4 = arith.constant 0.000000e+00 : f32
    %6 = vector.broadcast %cst_4 : f32 to vector<4x3x32xf32>
    %c0_5 = arith.constant 0 : index
    %c0_6 = arith.constant 0 : index
    %c0_7 = arith.constant 0 : index
    %7 = vector.load %arg13[%c0_5, %c0_6, %c0_7] : memref<4x70x32xf32, #tpu.memory_space<vmem>>, vector<4x3x32xf32>
    tpu.vector_store %arg13[%c0_5, %c0_6, %c0_7], %6 {strides = array<i32>} : memref<4x70x32xf32, #tpu.memory_space<vmem>>, vector<4x3x32xf32>,
    %c0_8 = arith.constant 0 : index
    %c67 = arith.constant 67 : index
    %c0_9 = arith.constant 0 : index
    %8 = vector.load %arg13[%c0_8, %c67, %c0_9] : memref<4x70x32xf32, #tpu.memory_space<vmem>>, vector<4x3x32xf32>
    tpu.vector_store %arg13[%c0_8, %c67, %c0_9], %6 {strides = array<i32>} : memref<4x70x32xf32, #tpu.memory_space<vmem>>, vector<4x3x32xf32>,
    %c0_10 = arith.constant 0 : index
    %c3 = arith.constant 3 : index
    %c0_11 = arith.constant 0 : index
    %9 = vector.load %arg13[%c0_10, %c3, %c0_11] : memref<4x70x32xf32, #tpu.memory_space<vmem>>, vector<4x64x32xf32>
    tpu.vector_store %arg13[%c0_10, %c3, %c0_11], %5 {strides = array<i32>} : memref<4x70x32xf32, #tpu.memory_space<vmem>>, vector<4x64x32xf32>,
    %c0_12 = arith.constant 0 : index
    %c0_13 = arith.constant 0 : index
    %10 = vector.load %arg2[%c0_12, %c0_13] : memref<7x32xf32, #tpu.memory_space<vmem>>, vector<7x32xf32>
    %cst_14 = arith.constant 0.000000e+00 : f32
    %11 = vector.broadcast %cst_14 : f32 to vector<4x32x32xf32>
    %c0_15 = arith.constant 0 : index
    %c0_16 = arith.constant 0 : index
    %c0_17 = arith.constant 0 : index
    %12 = tpu.strided_load %arg13[%c0_15, %c0_16, %c0_17] {strides = array<i32: 1, 2, 1>} : memref<4x70x32xf32, #tpu.memory_space<vmem>>, vector<4x32x32xf32>
    %13 = vector.extract_strided_slice %10 {offsets = [0, 0], sizes = [1, 32], strides = [1, 1]} : vector<7x32xf32> to vector<1x32xf32>
    %14 = vector.shape_cast %13 : vector<1x32xf32> to vector<1x1x32xf32>
    %15 = vector.broadcast %14 : vector<1x1x32xf32> to vector<4x32x32xf32>
    %16 = arith.mulf %12, %15 : vector<4x32x32xf32>
    %17 = arith.addf %11, %16 : vector<4x32x32xf32>
    %c0_18 = arith.constant 0 : index
    %c1 = arith.constant 1 : index
    %c0_19 = arith.constant 0 : index
    %18 = tpu.strided_load %arg13[%c0_18, %c1, %c0_19] {strides = array<i32: 1, 2, 1>} : memref<4x70x32xf32, #tpu.memory_space<vmem>>, vector<4x32x32xf32>
    %19 = vector.extract_strided_slice %10 {offsets = [1, 0], sizes = [1, 32], strides = [1, 1]} : vector<7x32xf32> to vector<1x32xf32>
    %20 = vector.shape_cast %19 : vector<1x32xf32> to vector<1x1x32xf32>
    %21 = vector.broadcast %20 : vector<1x1x32xf32> to vector<4x32x32xf32>
    %22 = arith.mulf %18, %21 : vector<4x32x32xf32>
    %23 = arith.addf %17, %22 : vector<4x32x32xf32>
    %c0_20 = arith.constant 0 : index
    %c2 = arith.constant 2 : index
    %c0_21 = arith.constant 0 : index
    %24 = tpu.strided_load %arg13[%c0_20, %c2, %c0_21] {strides = array<i32: 1, 2, 1>} : memref<4x70x32xf32, #tpu.memory_space<vmem>>, vector<4x32x32xf32>
    %25 = vector.extract_strided_slice %10 {offsets = [2, 0], sizes = [1, 32], strides = [1, 1]} : vector<7x32xf32> to vector<1x32xf32>
    %26 = vector.shape_cast %25 : vector<1x32xf32> to vector<1x1x32xf32>
    %27 = vector.broadcast %26 : vector<1x1x32xf32> to vector<4x32x32xf32>
    %28 = arith.mulf %24, %27 : vector<4x32x32xf32>
    %29 = arith.addf %23, %28 : vector<4x32x32xf32>
    %c0_22 = arith.constant 0 : index
    %c3_23 = arith.constant 3 : index
    %c0_24 = arith.constant 0 : index
    %30 = tpu.strided_load %arg13[%c0_22, %c3_23, %c0_24] {strides = array<i32: 1, 2, 1>} : memref<4x70x32xf32, #tpu.memory_space<vmem>>, vector<4x32x32xf32>
    %31 = vector.extract_strided_slice %10 {offsets = [3, 0], sizes = [1, 32], strides = [1, 1]} : vector<7x32xf32> to vector<1x32xf32>
    %32 = vector.shape_cast %31 : vector<1x32xf32> to vector<1x1x32xf32>
    %33 = vector.broadcast %32 : vector<1x1x32xf32> to vector<4x32x32xf32>
    %34 = arith.mulf %30, %33 : vector<4x32x32xf32>
    %35 = arith.addf %29, %34 : vector<4x32x32xf32>
    %c0_25 = arith.constant 0 : index
    %c4 = arith.constant 4 : index
    %c0_26 = arith.constant 0 : index
    %36 = tpu.strided_load %arg13[%c0_25, %c4, %c0_26] {strides = array<i32: 1, 2, 1>} : memref<4x70x32xf32, #tpu.memory_space<vmem>>, vector<4x32x32xf32>
    %37 = vector.extract_strided_slice %10 {offsets = [4, 0], sizes = [1, 32], strides = [1, 1]} : vector<7x32xf32> to vector<1x32xf32>
    %38 = vector.shape_cast %37 : vector<1x32xf32> to vector<1x1x32xf32>
    %39 = vector.broadcast %38 : vector<1x1x32xf32> to vector<4x32x32xf32>
    %40 = arith.mulf %36, %39 : vector<4x32x32xf32>
    %41 = arith.addf %35, %40 : vector<4x32x32xf32>
    %c0_27 = arith.constant 0 : index
    %c5 = arith.constant 5 : index
    %c0_28 = arith.constant 0 : index
    %42 = tpu.strided_load %arg13[%c0_27, %c5, %c0_28] {strides = array<i32: 1, 2, 1>} : memref<4x70x32xf32, #tpu.memory_space<vmem>>, vector<4x32x32xf32>
    %43 = vector.extract_strided_slice %10 {offsets = [5, 0], sizes = [1, 32], strides = [1, 1]} : vector<7x32xf32> to vector<1x32xf32>
    %44 = vector.shape_cast %43 : vector<1x32xf32> to vector<1x1x32xf32>
    %45 = vector.broadcast %44 : vector<1x1x32xf32> to vector<4x32x32xf32>
    %46 = arith.mulf %42, %45 : vector<4x32x32xf32>
    %47 = arith.addf %41, %46 : vector<4x32x32xf32>
    %c0_29 = arith.constant 0 : index
    %c6 = arith.constant 6 : index
    %c0_30 = arith.constant 0 : index
    %48 = tpu.strided_load %arg13[%c0_29, %c6, %c0_30] {strides = array<i32: 1, 2, 1>} : memref<4x70x32xf32, #tpu.memory_space<vmem>>, vector<4x32x32xf32>
    %49 = vector.extract_strided_slice %10 {offsets = [6, 0], sizes = [1, 32], strides = [1, 1]} : vector<7x32xf32> to vector<1x32xf32>
    %50 = vector.shape_cast %49 : vector<1x32xf32> to vector<1x1x32xf32>
    %51 = vector.broadcast %50 : vector<1x1x32xf32> to vector<4x32x32xf32>
    %52 = arith.mulf %48, %51 : vector<4x32x32xf32>
    %53 = arith.addf %47, %52 : vector<4x32x32xf32>
    %c0_31 = arith.constant 0 : index
    %c0_32 = arith.constant 0 : index
    %54 = vector.load %arg3[%c0_31, %c0_32] : memref<1x32xf32, #tpu.memory_space<vmem>>, vector<1x32xf32>
    %55 = vector.shape_cast %54 : vector<1x32xf32> to vector<1x1x32xf32>
    %56 = vector.broadcast %55 : vector<1x1x32xf32> to vector<4x32x32xf32>
    %57 = arith.addf %53, %56 : vector<4x32x32xf32>
    %cst_33 = arith.constant 0.000000e+00 : f32
    %58 = vector.broadcast %cst_33 : f32 to vector<4x32x32xf32>
    %59 = arith.maximumf %57, %58 : vector<4x32x32xf32>
    %60 = vector.shape_cast %59 : vector<4x32x32xf32> to vector<128x32xf32>
    %61 = arith.truncf %60 : vector<128x32xf32> to vector<128x32xbf16>
    %c0_34 = arith.constant 0 : index
    %c0_35 = arith.constant 0 : index
    %62 = vector.load %arg4[%c0_34, %c0_35] : memref<32x128xbf16, #tpu.memory_space<vmem>>, vector<32x128xbf16>
    %cst_36 = arith.constant dense<0.000000e+00> : vector<128x128xf32>
    %63 = tpu.matmul %61, %62, %cst_36 {dimension_numbers = #tpu.dot_dimension_numbers<[1], [0], [0], [1], [0, 0, 1, 1], [], []>} : vector<128x32xbf16>, vector<32x128xbf16>, vector<128x128xf32> -> vector<128x128xf32>
    %c0_37 = arith.constant 0 : index
    %c0_38 = arith.constant 0 : index
    %64 = vector.load %arg5[%c0_37, %c0_38] : memref<1x128xf32, #tpu.memory_space<vmem>>, vector<1x128xf32>
    %65 = vector.broadcast %64 : vector<1x128xf32> to vector<128x128xf32>
    %66 = arith.addf %63, %65 : vector<128x128xf32>
    %cst_39 = arith.constant 0.000000e+00 : f32
    %67 = vector.broadcast %cst_39 : f32 to vector<128x128xf32>
    %68 = arith.maximumf %66, %67 : vector<128x128xf32>
    %69 = vector.shape_cast %68 : vector<128x128xf32> to vector<4x32x128xf32>
    %cst_40 = arith.constant 0.000000e+00 : f32
    %70 = vector.broadcast %cst_40 : f32 to vector<4x2x128xf32>
    %c0_41 = arith.constant 0 : index
    %c0_42 = arith.constant 0 : index
    %c0_43 = arith.constant 0 : index
    %71 = vector.load %arg14[%c0_41, %c0_42, %c0_43] : memref<4x36x128xf32, #tpu.memory_space<vmem>>, vector<4x2x128xf32>
    tpu.vector_store %arg14[%c0_41, %c0_42, %c0_43], %70 {strides = array<i32>} : memref<4x36x128xf32, #tpu.memory_space<vmem>>, vector<4x2x128xf32>,
    %c0_44 = arith.constant 0 : index
    %c34 = arith.constant 34 : index
    %c0_45 = arith.constant 0 : index
    %72 = vector.load %arg14[%c0_44, %c34, %c0_45] : memref<4x36x128xf32, #tpu.memory_space<vmem>>, vector<4x2x128xf32>
    tpu.vector_store %arg14[%c0_44, %c34, %c0_45], %70 {strides = array<i32>} : memref<4x36x128xf32, #tpu.memory_space<vmem>>, vector<4x2x128xf32>,
    %c0_46 = arith.constant 0 : index
    %c2_47 = arith.constant 2 : index
    %c0_48 = arith.constant 0 : index
    %73 = vector.load %arg14[%c0_46, %c2_47, %c0_48] : memref<4x36x128xf32, #tpu.memory_space<vmem>>, vector<4x32x128xf32>
    tpu.vector_store %arg14[%c0_46, %c2_47, %c0_48], %69 {strides = array<i32>} : memref<4x36x128xf32, #tpu.memory_space<vmem>>, vector<4x32x128xf32>,
    %c0_49 = arith.constant 0 : index
    %c0_50 = arith.constant 0 : index
    %74 = vector.load %arg6[%c0_49, %c0_50] : memref<5x128xf32, #tpu.memory_space<vmem>>, vector<5x128xf32>
    %cst_51 = arith.constant 0.000000e+00 : f32
    %75 = vector.broadcast %cst_51 : f32 to vector<4x32x128xf32>
    %c0_52 = arith.constant 0 : index
    %c0_53 = arith.constant 0 : index
    %c0_54 = arith.constant 0 : index
    %76 = vector.load %arg14[%c0_52, %c0_53, %c0_54] : memref<4x36x128xf32, #tpu.memory_space<vmem>>, vector<4x32x128xf32>
    %77 = vector.extract_strided_slice %74 {offsets = [0, 0], sizes = [1, 128], strides = [1, 1]} : vector<5x128xf32> to vector<1x128xf32>
    %78 = vector.shape_cast %77 : vector<1x128xf32> to vector<1x1x128xf32>
    %79 = vector.broadcast %78 : vector<1x1x128xf32> to vector<4x32x128xf32>
    %80 = arith.mulf %76, %79 : vector<4x32x128xf32>
    %81 = arith.addf %75, %80 : vector<4x32x128xf32>
    %c0_55 = arith.constant 0 : index
    %c1_56 = arith.constant 1 : index
    %c0_57 = arith.constant 0 : index
    %82 = vector.load %arg14[%c0_55, %c1_56, %c0_57] : memref<4x36x128xf32, #tpu.memory_space<vmem>>, vector<4x32x128xf32>
    %83 = vector.extract_strided_slice %74 {offsets = [1, 0], sizes = [1, 128], strides = [1, 1]} : vector<5x128xf32> to vector<1x128xf32>
    %84 = vector.shape_cast %83 : vector<1x128xf32> to vector<1x1x128xf32>
    %85 = vector.broadcast %84 : vector<1x1x128xf32> to vector<4x32x128xf32>
    %86 = arith.mulf %82, %85 : vector<4x32x128xf32>
    %87 = arith.addf %81, %86 : vector<4x32x128xf32>
    %c0_58 = arith.constant 0 : index
    %c2_59 = arith.constant 2 : index
    %c0_60 = arith.constant 0 : index
    %88 = vector.load %arg14[%c0_58, %c2_59, %c0_60] : memref<4x36x128xf32, #tpu.memory_space<vmem>>, vector<4x32x128xf32>
    %89 = vector.extract_strided_slice %74 {offsets = [2, 0], sizes = [1, 128], strides = [1, 1]} : vector<5x128xf32> to vector<1x128xf32>
    %90 = vector.shape_cast %89 : vector<1x128xf32> to vector<1x1x128xf32>
    %91 = vector.broadcast %90 : vector<1x1x128xf32> to vector<4x32x128xf32>
    %92 = arith.mulf %88, %91 : vector<4x32x128xf32>
    %93 = arith.addf %87, %92 : vector<4x32x128xf32>
    %c0_61 = arith.constant 0 : index
    %c3_62 = arith.constant 3 : index
    %c0_63 = arith.constant 0 : index
    %94 = vector.load %arg14[%c0_61, %c3_62, %c0_63] : memref<4x36x128xf32, #tpu.memory_space<vmem>>, vector<4x32x128xf32>
    %95 = vector.extract_strided_slice %74 {offsets = [3, 0], sizes = [1, 128], strides = [1, 1]} : vector<5x128xf32> to vector<1x128xf32>
    %96 = vector.shape_cast %95 : vector<1x128xf32> to vector<1x1x128xf32>
    %97 = vector.broadcast %96 : vector<1x1x128xf32> to vector<4x32x128xf32>
    %98 = arith.mulf %94, %97 : vector<4x32x128xf32>
    %99 = arith.addf %93, %98 : vector<4x32x128xf32>
    %c0_64 = arith.constant 0 : index
    %c4_65 = arith.constant 4 : index
    %c0_66 = arith.constant 0 : index
    %100 = vector.load %arg14[%c0_64, %c4_65, %c0_66] : memref<4x36x128xf32, #tpu.memory_space<vmem>>, vector<4x32x128xf32>
    %101 = vector.extract_strided_slice %74 {offsets = [4, 0], sizes = [1, 128], strides = [1, 1]} : vector<5x128xf32> to vector<1x128xf32>
    %102 = vector.shape_cast %101 : vector<1x128xf32> to vector<1x1x128xf32>
    %103 = vector.broadcast %102 : vector<1x1x128xf32> to vector<4x32x128xf32>
    %104 = arith.mulf %100, %103 : vector<4x32x128xf32>
    %105 = arith.addf %99, %104 : vector<4x32x128xf32>
    %c0_67 = arith.constant 0 : index
    %c0_68 = arith.constant 0 : index
    %106 = vector.load %arg7[%c0_67, %c0_68] : memref<1x128xf32, #tpu.memory_space<vmem>>, vector<1x128xf32>
    %107 = vector.shape_cast %106 : vector<1x128xf32> to vector<1x1x128xf32>
    %108 = vector.broadcast %107 : vector<1x1x128xf32> to vector<4x32x128xf32>
    %109 = arith.addf %105, %108 : vector<4x32x128xf32>
    %cst_69 = arith.constant 0.000000e+00 : f32
    %110 = vector.broadcast %cst_69 : f32 to vector<4x32x128xf32>
    %111 = arith.maximumf %109, %110 : vector<4x32x128xf32>
    %112 = vector.shape_cast %111 : vector<4x32x128xf32> to vector<128x128xf32>
    %113 = arith.truncf %112 : vector<128x128xf32> to vector<128x128xbf16>
    %c0_70 = arith.constant 0 : index
    %c0_71 = arith.constant 0 : index
    %114 = vector.load %arg8[%c0_70, %c0_71] : memref<128x128xbf16, #tpu.memory_space<vmem>>, vector<128x128xbf16>
    %cst_72 = arith.constant dense<0.000000e+00> : vector<128x128xf32>
    %115 = tpu.matmul %113, %114, %cst_72 {dimension_numbers = #tpu.dot_dimension_numbers<[1], [0], [0], [1], [0, 0, 1, 1], [], []>} : vector<128x128xbf16>, vector<128x128xbf16>, vector<128x128xf32> -> vector<128x128xf32>
    %c0_73 = arith.constant 0 : index
    %c0_74 = arith.constant 0 : index
    %116 = vector.load %arg9[%c0_73, %c0_74] : memref<1x128xf32, #tpu.memory_space<vmem>>, vector<1x128xf32>
    %117 = vector.broadcast %116 : vector<1x128xf32> to vector<128x128xf32>
    %118 = arith.addf %115, %117 : vector<128x128xf32>
    %cst_75 = arith.constant 0.000000e+00 : f32
    %119 = vector.broadcast %cst_75 : f32 to vector<128x128xf32>
    %120 = arith.maximumf %118, %119 : vector<128x128xf32>
    %121 = vector.shape_cast %120 : vector<128x128xf32> to vector<4x32x128xf32>
    %122 = arith.addf %121, %69 : vector<4x32x128xf32>
    %cst_76 = arith.constant dense<0xFF800000> : vector<4x128xf32>
    %123 = vector.multi_reduction <maximumf>, %122, %cst_76 [1] : vector<4x32x128xf32> to vector<4x128xf32>
    %124 = arith.truncf %123 : vector<4x128xf32> to vector<4x128xbf16>
    %c0_77 = arith.constant 0 : index
    %c0_78 = arith.constant 0 : index
    %125 = vector.load %arg10[%c0_77, %c0_78] : memref<128x128xbf16, #tpu.memory_space<vmem>>, vector<128x128xbf16>
    %cst_79 = arith.constant dense<0.000000e+00> : vector<4x128xf32>
    %126 = tpu.matmul %124, %125, %cst_79 {dimension_numbers = #tpu.dot_dimension_numbers<[1], [0], [0], [1], [0, 0, 1, 1], [], []>} : vector<4x128xbf16>, vector<128x128xbf16>, vector<4x128xf32> -> vector<4x128xf32>
    %c0_80 = arith.constant 0 : index
    %c0_81 = arith.constant 0 : index
    %127 = vector.load %arg11[%c0_80, %c0_81] : memref<1x128xf32, #tpu.memory_space<vmem>>, vector<1x128xf32>
    %128 = vector.broadcast %127 : vector<1x128xf32> to vector<4x128xf32>
    %129 = arith.addf %126, %128 : vector<4x128xf32>
    %c0_82 = arith.constant 0 : index
    %c0_83 = arith.constant 0 : index
    %c0_84 = arith.constant 0 : index
    %130 = vector.load %arg12[%c0_82, %c0_83, %c0_84] : memref<1x4x128xf32, #tpu.memory_space<vmem>>, vector<1x4x128xf32>
    %131 = vector.shape_cast %130 : vector<1x4x128xf32> to vector<4x128xf32>
    %132 = vector.shape_cast %129 : vector<4x128xf32> to vector<1x4x128xf32>
    tpu.vector_store %arg12[%c0_82, %c0_83, %c0_84], %132 {strides = array<i32>} : memref<1x4x128xf32, #tpu.memory_space<vmem>>, vector<1x4x128xf32>,
    return
  }
  func.func @transform_0(%arg0: i32) -> (i32, i32, i32, i32) {
    %c0_i32 = arith.constant 0 : i32
    %c0_i32_0 = arith.constant 0 : i32
    %c0_i32_1 = arith.constant 0 : i32
    %c0_i32_2 = arith.constant 0 : i32
    return %arg0, %c0_i32, %c0_i32_0, %c0_i32_1 : i32, i32, i32, i32
  }
  func.func @transform_1(%arg0: i32) -> (i32, i32) {
    %c0_i32 = arith.constant 0 : i32
    %c0_i32_0 = arith.constant 0 : i32
    %c0_i32_1 = arith.constant 0 : i32
    return %c0_i32, %c0_i32_0 : i32, i32
  }
  func.func @transform_2(%arg0: i32) -> (i32, i32) {
    %c0_i32 = arith.constant 0 : i32
    %c0_i32_0 = arith.constant 0 : i32
    %c0_i32_1 = arith.constant 0 : i32
    return %c0_i32, %c0_i32_0 : i32, i32
  }
  func.func @transform_3(%arg0: i32) -> (i32, i32) {
    %c0_i32 = arith.constant 0 : i32
    %c0_i32_0 = arith.constant 0 : i32
    %c0_i32_1 = arith.constant 0 : i32
    return %c0_i32, %c0_i32_0 : i32, i32
  }
  func.func @transform_4(%arg0: i32) -> (i32, i32) {
    %c0_i32 = arith.constant 0 : i32
    %c0_i32_0 = arith.constant 0 : i32
    %c0_i32_1 = arith.constant 0 : i32
    return %c0_i32, %c0_i32_0 : i32, i32
  }
  func.func @transform_5(%arg0: i32) -> (i32, i32) {
    %c0_i32 = arith.constant 0 : i32
    %c0_i32_0 = arith.constant 0 : i32
    %c0_i32_1 = arith.constant 0 : i32
    return %c0_i32, %c0_i32_0 : i32, i32
  }
  func.func @transform_6(%arg0: i32) -> (i32, i32) {
    %c0_i32 = arith.constant 0 : i32
    %c0_i32_0 = arith.constant 0 : i32
    %c0_i32_1 = arith.constant 0 : i32
    return %c0_i32, %c0_i32_0 : i32, i32
  }
  func.func @transform_7(%arg0: i32) -> (i32, i32) {
    %c0_i32 = arith.constant 0 : i32
    %c0_i32_0 = arith.constant 0 : i32
    %c0_i32_1 = arith.constant 0 : i32
    return %c0_i32, %c0_i32_0 : i32, i32
  }
  func.func @transform_8(%arg0: i32) -> (i32, i32) {
    %c0_i32 = arith.constant 0 : i32
    %c0_i32_0 = arith.constant 0 : i32
    %c0_i32_1 = arith.constant 0 : i32
    return %c0_i32, %c0_i32_0 : i32, i32
  }
  func.func @transform_9(%arg0: i32) -> (i32, i32) {
    %c0_i32 = arith.constant 0 : i32
    %c0_i32_0 = arith.constant 0 : i32
    %c0_i32_1 = arith.constant 0 : i32
    return %c0_i32, %c0_i32_0 : i32, i32
  }
  func.func @transform_10(%arg0: i32) -> (i32, i32) {
    %c0_i32 = arith.constant 0 : i32
    %c0_i32_0 = arith.constant 0 : i32
    %c0_i32_1 = arith.constant 0 : i32
    return %c0_i32, %c0_i32_0 : i32, i32
  }
  func.func @transform_11(%arg0: i32) -> (i32, i32, i32) {
    %c0_i32 = arith.constant 0 : i32
    %c0_i32_0 = arith.constant 0 : i32
    %c0_i32_1 = arith.constant 0 : i32
    return %arg0, %c0_i32, %c0_i32_0 : i32, i32, i32
  }
}

</mosaic_0001>

<bundles_post_ra>
// kernel: tpu_custom_call.1
= control target key start
LH: loop header
LB: loop body
LE: loop exit
PB: predicated region body
PF: predicated region fallthrough
CT: control target
= control target key end

     0   :  { %16 = vsyncpa [#allocation5], 0  ;;  %s3021_s0 = inlined_call_operand.vmem [shape: f32[2,4,64,32], index: 0, kind: input, shape index: {}]   ;;  %s3022_s1 = inlined_call_operand.vmem [shape: f32[7,32], index: 1, kind: input, shape index: {}]   ;;  %s3023_s2 = inlined_call_operand.vmem [shape: f32[1,32], index: 2, kind: input, shape index: {}]   ;;  %s3024_s3 = inlined_call_operand.vmem [shape: bf16[32,128], index: 3, kind: input, shape index: {}]   ;;  %s3025_s4 = inlined_call_operand.vmem [shape: f32[1,128], index: 4, kind: input, shape index: {}]   ;;  %s3026_s5 = inlined_call_operand.vmem [shape: f32[5,128], index: 5, kind: input, shape index: {}]   ;;  %s3027_s6 = inlined_call_operand.vmem [shape: f32[1,128], index: 6, kind: input, shape index: {}]   ;;  %s3028_s7 = inlined_call_operand.vmem [shape: bf16[128,128], index: 7, kind: input, shape index: {}]   ;;  %s3029_s8 = inlined_call_operand.vmem [shape: f32[1,128], index: 8, kind: input, shape index: {}]   ;;  %s3030_s9 = inlined_call_operand.vmem [shape: bf16[128,128], index: 9, kind: input, shape index: {}]   ;;  %s3031_s10 = inlined_call_operand.vmem [shape: f32[1,128], index: 10, kind: input, shape index: {}]   ;;  %s3032_s11 = inlined_call_operand.hbm [shape: f32[2,4,128], index: 11, kind: output, shape index: {}]  }
   0x1   :  { %18 = vsyncpa [#allocation5 + $0x1], 0  ;;  %s2316_s17 = smov 0   ;;  %s2318_s18 = smov 0  }
   0x2   :  { %s2320_s19 = smov 0   ;;  %s2322_s20 = smov 0  }
   0x3 LB: > { %s2337_s21 = sadd.s32 4294967295, %s2251_s20   ;;  %s1980_s22 = sadd.s32 4294967294, %s2251_s20   ;;  %s2251_s20 = sphi %s2322_s20, %s3038_s20   ;;  %s2247_s19 = sphi %s2320_s19, %s3037_s19   ;;  %s2243_s18 = sphi %s2318_s18, %s3036_s18   ;;  %s2239_s17 = sphi %s2316_s17, %s3035_s17  }
   0x4   : > { %s2341_s23 = sadd.s32 1, %s2251_s20   ;;  %s267_s24 = sadd.s32 1, %s2247_s19 }
   0x5   : > { %s264_s25 = ssub.s32 %s2251_s20, %s2341_s23  ;;  %p277_p0 = scmp.ne.s32.totalorder %s2247_s19, %s2243_s18 }
   0x6   : > { %p265_p1 = scmp.eq.s32.totalorder %s264_s25, 0  ;;  %p278_p2 = scmp.eq.s32.totalorder %s2337_s21, 1 }
   0x7   : > { %p283_p3 = scmp.ne.s32.totalorder %s2243_s18, %s2239_s17  ;;  %p284_p4 = scmp.eq.s32.totalorder %s1980_s22, 1 }
   0x8   : > { %s2352_s26 = scalar_select %p265_p1, %s2247_s19, %s267_s24  }
   0x9   : > { %p2354_p5 = por %p278_p2, %p277_p0  ;;  %p2358_p6 = por %p284_p4, %p283_p3 }
   0xa   : > { %p1983_p7 = scmp.ge.s32.totalorder %s2251_s20, 1  ;;  %p340_p8 = scmp.lt.s32.totalorder %s2251_s20, 3 }
   0xc   : > { %p341_p9 = pnand %p1983_p7, %p340_p8 }
   0xd   : > { %v2171_v0 = vld [vmem:[%s3024_s3] sm:$0xff] (!%p341_p9)   ;;  %p380_p10 = scmp.lt.s32.totalorder (!%p341_p9), %s2337_s21, 1  ;;  %v556_v1 = vlaneseq (!%p341_p9)  ;;  %v2172_v2 = vld [vmem:[%s3024_s3 + $0x8] sm:$0xff] (!%p341_p9)   ;;  %vm482_vm0 = vcmask (!%p341_p9), 256000   ;;  %v2253_v4 = vmov (!%p341_p9), 0.0   ;;  %vm491_vm1 = vcmask (!%p341_p9), 261120  }
   0xe   : > { %344 = sbr.rel (%p341_p9) target bundleno = 844 (0x34c), region = 64  ;;  %2058 = vmatprep.subr.bf16.mxu0 (!%p341_p9), %v2171_v0  ;;  %483 = vst.msk [vmem:[#allocation2] sm:$0x7] (!%p341_p9), %vm482_vm0, %v2253_v4  ;;  %v2378_v5 = vld [vmem:[%s3022_s1] sm:$0x7f] (!%p341_p9)  ;;  %vm2254_vm2 = vmmov (!%p341_p9), 0  }
   0xf   : > { %v2372_v3 = vshrl.u32 (!%p341_p9), %v556_v1, 7  ;;  %2059 = vmatpush3.bf16.msra.mxu0 (!%p341_p9), %v2171_v0  ;;  %484 = vst.msk [vmem:[#allocation2 + $0x48] sm:$0x7] (!%p341_p9), %vm482_vm0, %v2253_v4  ;;  %485 = vst.msk [vmem:[#allocation2 + $0x90] sm:$0x7] (!%p341_p9), %vm482_vm0, %v2253_v4  ;;  %vm1810_vm3 = vcmask (!%p341_p9), 1041409  }
  0x10   : > { %486 = vst.msk [vmem:[#allocation2 + $0xd8] sm:$0x7] (!%p341_p9), %vm482_vm0, %v2253_v4  ;;  %487 = vst.msk [vmem:[#allocation2 + $0x43] sm:$0x7] (!%p341_p9), %vm482_vm0, %v2253_v4  ;;  %2060 = vmatprep.subr.bf16.mxu0 (!%p341_p9), %v2172_v2  ;;  %vm1812_vm4 = vcmask (!%p341_p9), 1042434   ;;  %vm1814_vm5 = vcmask (!%p341_p9), 1043459  }
  0x11   : > { %488 = vst.msk [vmem:[#allocation2 + $0x8b] sm:$0x7] (!%p341_p9), %vm482_vm0, %v2253_v4  ;;  %489 = vst.msk [vmem:[#allocation2 + $0xd3] sm:$0x7] (!%p341_p9), %vm482_vm0, %v2253_v4  ;;  %v558_v6 = vsub.s32 (!%p341_p9), 0, %v2372_v3  ;;  %v626_v7 = vsub.s32 (!%p341_p9), 1, %v2372_v3 }
  0x12   : > { %490 = vst.msk [vmem:[#allocation2 + $0x11b] sm:$0x7] (!%p341_p9), %vm482_vm0, %v2253_v4  ;;  %1207 = vst [vmem:[#allocation3] sm:$0x3] (!%p341_p9), %v2253_v4  ;;  %v694_v8 = vsub.s32 (!%p341_p9), 2, %v2372_v3  ;;  %v762_v9 = vsub.s32 (!%p341_p9), 3, %v2372_v3 }
  0x13   : > { %1208 = vst [vmem:[#allocation3 + $0x28] sm:$0x3] (!%p341_p9), %v2253_v4  ;;  %1209 = vst [vmem:[#allocation3 + $0x50] sm:$0x3] (!%p341_p9), %v2253_v4  ;;  %v830_v10 = vsub.s32 (!%p341_p9), 4, %v2372_v3  ;;  %v2411_v14 = vrot.slane (!%p341_p9), %v2378_v5, %v558_v6  ;;  %v2416_v15 = vrot.slane (!%p341_p9), %v2378_v5, %v626_v7  ;;  %v898_v16 = vsub.s32 (!%p341_p9), 5, %v2372_v3  ;;  %2061 = vmatpush3.bf16.msra.mxu0 (!%p341_p9), %v2172_v2 }
  0x14   : > { %1210 = vst [vmem:[#allocation3 + $0x78] sm:$0x3] (!%p341_p9), %v2253_v4  ;;  %1211 = vst [vmem:[#allocation3 + $0x22] sm:$0x3] (!%p341_p9), %v2253_v4  ;;  %v966_v17 = vsub.s32 (!%p341_p9), 6, %v2372_v3  ;;  %v2425_v23 = vrot.slane (!%p341_p9), %v2378_v5, %v694_v8  ;;  %v2431_v27 = vrot.slane (!%p341_p9), %v2378_v5, %v762_v9  ;;  %2110 = vmatprep.subr.bf16.mxu0 (!%p341_p9), %v2253_v4  ;;  %s377_s13 = sand.u32 (!%p341_p9), 1, %s2243_s18  }
  0x15   : > { %s381_s14 = scalar_select %p380_p10, %s2337_s21, 1  ;;  %1212 = vst [vmem:[#allocation3 + $0x4a] sm:$0x3] %v2253_v4  ;;  %1213 = vst [vmem:[#allocation3 + $0x72] sm:$0x3] %v2253_v4  ;;  %v2436_v28 = vrot.slane %v2378_v5, %v830_v10 }
  0x16   : > { %1214 = vst [vmem:[#allocation3 + $0x9a] sm:$0x3] %v2253_v4  ;;  %s1908_s15 = scalar_lea.sflag [#allocation5], %s377_s13 }
  0x17   : > { %s2022_s22 = sshll.u32 %s381_s14, 8  ;;  %s1984_s14 = sshll.u32 %s377_s13, 2 }
  0x18   : > { %s2402_s29 = scalar_lea.vmem %s3021_s0, %s2022_s22  ;;  %s2019_s22 = sshll.u32 %s2337_s21, 6 }
  0x19   : > { %v386_v11 = vld [vmem:[%s2402_s29] sm:$0xff]  ;;  %v387_v12 = vld [vmem:[%s2402_s29 + $0x8] sm:$0xff]  ;;  %v388_v13 = vld [vmem:[%s2402_s29 + $0x10] sm:$0xff]  ;;  %s379_s24 = scalar_lea.vmem [#allocation4], %s1984_s14  ;;  %s2979_s12 = scalar_lea.hbm %s3032_s11, %s2019_s22 }
  0x1a   : > { %v389_v18 = vld [vmem:[%s2402_s29 + $0x18] sm:$0xff]  ;;  %v390_v19 = vld [vmem:[%s2402_s29 + $0x20] sm:$0xff]  ;;  %v418_v20 = vmax.f32 %v386_v11, -2.0  ;;  %v419_v21 = vmax.f32 %v387_v12, -2.0  ;;  %v420_v22 = vmax.f32 %v388_v13, -2.0  ;;  %v391_v24 = vld [vmem:[%s2402_s29 + $0x28] sm:$0xff] }
  0x1b   : > { %v421_v25 = vmax.f32 %v389_v18, -2.0  ;;  %v422_v26 = vmax.f32 %v390_v19, -2.0  ;;  %v392_v29 = vld [vmem:[%s2402_s29 + $0x30] sm:$0xff]  ;;  %v393_v30 = vld [vmem:[%s2402_s29 + $0x38] sm:$0xff]  ;;  %v394_v31 = vld [vmem:[%s2402_s29 + $0x40] sm:$0xff]  ;;  %v423_v35 = vmax.f32 %v391_v24, -2.0 }
  0x1c   : > { %v450_v32 = vmin.f32 %v418_v20, 3.0  ;;  %v451_v33 = vmin.f32 %v419_v21, 3.0  ;;  %v452_v34 = vmin.f32 %v420_v22, 3.0  ;;  %v395_v36 = vld [vmem:[%s2402_s29 + $0x48] sm:$0xff]  ;;  %v396_v37 = vld [vmem:[%s2402_s29 + $0x50] sm:$0xff]  ;;  %v424_v40 = vmax.f32 %v392_v29, -2.0 }
  0x1d   : > { %v453_v38 = vmin.f32 %v421_v25, 3.0  ;;  %v454_v39 = vmin.f32 %v422_v26, 3.0  ;;  %v425_v41 = vmax.f32 %v393_v30, -2.0  ;;  %v397_v42 = vld [vmem:[%s2402_s29 + $0x58] sm:$0xff]  ;;  %v398_v43 = vld [vmem:[%s2402_s29 + $0x60] sm:$0xff]  ;;  %v455_v44 = vmin.f32 %v423_v35, 3.0 }
  0x1e   : > { %492 = vst.msk [vmem:[#allocation2 + $0x3] sm:$0xff] %vm491_vm1, %v450_v32  ;;  %493 = vst.msk [vmem:[#allocation2 + $0xb] sm:$0xff] %vm491_vm1, %v451_v33  ;;  %v426_v45 = vmax.f32 %v394_v31, -2.0  ;;  %v427_v46 = vmax.f32 %v395_v36, -2.0  ;;  %v428_v47 = vmax.f32 %v396_v37, -2.0  ;;  %v399_v48 = vld [vmem:[%s2402_s29 + $0x68] sm:$0xff]  ;;  %v2481_v35 = vrot.slane %v2378_v5, %v898_v16 }
  0x1f   : > { %494 = vst.msk [vmem:[#allocation2 + $0x13] sm:$0xff] %vm491_vm1, %v452_v34  ;;  %v400_v49 = vld [vmem:[%s2402_s29 + $0x70] sm:$0xff]  ;;  %495 = vst.msk [vmem:[#allocation2 + $0x1b] sm:$0xff] %vm491_vm1, %v453_v38  ;;  %v456_v50 = vmin.f32 %v424_v40, 3.0  ;;  %v457_v51 = vmin.f32 %v425_v41, 3.0  ;;  %v429_v52 = vmax.f32 %v397_v42, -2.0  ;;  %v2491_v42 = vrot.slane %v2378_v5, %v966_v17 }
  0x20   : > { %496 = vst.msk [vmem:[#allocation2 + $0x23] sm:$0xff] %vm491_vm1, %v454_v39  ;;  %v430_v53 = vmax.f32 %v398_v43, -2.0  ;;  %v401_v54 = vld [vmem:[%s2402_s29 + $0x78] sm:$0xff]  ;;  %v402_v55 = vld [vmem:[%s2402_s29 + $0x80] sm:$0xff]  ;;  %497 = vst.msk [vmem:[#allocation2 + $0x2b] sm:$0xff] %vm491_vm1, %v455_v44  ;;  %v458_v56 = vmin.f32 %v426_v45, 3.0 }
  0x21   : > { %v459_v57 = vmin.f32 %v427_v46, 3.0  ;;  %v460_v58 = vmin.f32 %v428_v47, 3.0  ;;  %v431_v59 = vmax.f32 %v399_v48, -2.0  ;;  %v403_v60 = vld [vmem:[%s2402_s29 + $0x88] sm:$0xff]  ;;  %v404_v61 = vld [vmem:[%s2402_s29 + $0x90] sm:$0xff]  ;;  %498 = vst.msk [vmem:[#allocation2 + $0x33] sm:$0xff] %vm491_vm1, %v456_v50 }
  0x22   : > { %499 = vst.msk [vmem:[#allocation2 + $0x3b] sm:$0xff] %vm491_vm1, %v457_v51  ;;  %v461_v62 = vmin.f32 %v429_v52, 3.0  ;;  %v462_v63 = vmin.f32 %v430_v53, 3.0  ;;  %v432_v0 = vmax.f32 %v400_v49, -2.0  ;;  %v433_v1 = vmax.f32 %v401_v54, -2.0  ;;  %v2461_v2 = vld [vmem:[%s2402_s29 + $0x98] sm:$0xff] }
  0x23   : > { %v2464_v11 = vld [vmem:[%s2402_s29 + $0xa0] sm:$0xff]  ;;  %500 = vst.msk [vmem:[#allocation2 + $0x4b] sm:$0xff] %vm491_vm1, %v458_v56  ;;  %501 = vst.msk [vmem:[#allocation2 + $0x53] sm:$0xff] %vm491_vm1, %v459_v57  ;;  %v463_v12 = vmin.f32 %v431_v59, 3.0  ;;  %v434_v13 = vmax.f32 %v402_v55, -2.0  ;;  %v435_v18 = vmax.f32 %v403_v60, -2.0 }
  0x24   : > { %502 = vst.msk [vmem:[#allocation2 + $0x5b] sm:$0xff] %vm491_vm1, %v460_v58  ;;  %v436_v19 = vmax.f32 %v404_v61, -2.0  ;;  %v2470_v20 = vld [vmem:[%s2402_s29 + $0xa8] sm:$0xff]  ;;  %503 = vst.msk [vmem:[#allocation2 + $0x63] sm:$0xff] %vm491_vm1, %v461_v62  ;;  %v464_v21 = vmin.f32 %v432_v0, 3.0  ;;  %v465_v22 = vmin.f32 %v433_v1, 3.0 }
  0x25   : > { %504 = vst.msk [vmem:[#allocation2 + $0x6b] sm:$0xff] %vm491_vm1, %v462_v63  ;;  %v437_v24 = vmax.f32 %v2461_v2, -2.0  ;;  %v438_v25 = vmax.f32 %v2464_v11, -2.0  ;;  %505 = vst.msk [vmem:[#allocation2 + $0x73] sm:$0xff] %vm491_vm1, %v463_v12  ;;  %v466_v26 = vmin.f32 %v434_v13, 3.0  ;;  %v467_v29 = vmin.f32 %v435_v18, 3.0 }
  0x26   : > { %v468_v30 = vmin.f32 %v436_v19, 3.0  ;;  %v439_v31 = vmax.f32 %v2470_v20, -2.0  ;;  %v525_v32 = vld [vmem:[#allocation2] ss:$2 sm:$0xff]  ;;  %v593_v33 = vld [vmem:[#allocation2 + $0x1] ss:$2 sm:$0xff] }
  0x27   : > { %v661_v34 = vld [vmem:[#allocation2 + $0x2] ss:$2 sm:$0xff]  ;;  %506 = vst.msk [vmem:[#allocation2 + $0x7b] sm:$0xff] %vm491_vm1, %v464_v21  ;;  %507 = vst.msk [vmem:[#allocation2 + $0x83] sm:$0xff] %vm491_vm1, %v465_v22  ;;  %v560_v37 = vmul.f32 %v2411_v14, %v525_v32  ;;  %v595_v38 = vld [vmem:[#allocation2 + $0x11] ss:$2 sm:$0xff]  ;;  %v628_v39 = vmul.f32 %v2416_v15, %v593_v33 }
  0x28   : > { %v527_v36 = vld [vmem:[#allocation2 + $0x10] ss:$2 sm:$0xff]  ;;  %v696_v41 = vmul.f32 %v2425_v23, %v661_v34  ;;  %508 = vst.msk [vmem:[#allocation2 + $0x93] sm:$0xff] %vm491_vm1, %v466_v26  ;;  %509 = vst.msk [vmem:[#allocation2 + $0x9b] sm:$0xff] %vm491_vm1, %v467_v29  ;;  %v629_v43 = vmul.f32 %v2416_v15, %v595_v38  ;;  %v729_v45 = vld [vmem:[#allocation2 + $0x3] ss:$2 sm:$0xff] }
  0x29   : > { %v663_v40 = vld [vmem:[#allocation2 + $0x12] ss:$2 sm:$0xff]  ;;  %510 = vst.msk [vmem:[#allocation2 + $0xa3] sm:$0xff] %vm491_vm1, %v468_v30  ;;  %v561_v16 = vmul.f32 %v2411_v14, %v527_v36  ;;  %v731_v46 = vld [vmem:[#allocation2 + $0x13] ss:$2 sm:$0xff]  ;;  %v644_v48 = vadd.f32 %v628_v39, %v560_v37  ;;  %v764_v49 = vmul.f32 %v2431_v27, %v729_v45  ;;  %v411_v11 = vld [vmem:[%s2402_s29 + $0xc8] sm:$0xff] }
  0x2a   : > { %v697_v44 = vmul.f32 %v2425_v23, %v663_v40  ;;  %v797_v47 = vld [vmem:[#allocation2 + $0x4] ss:$2 sm:$0xff]  ;;  %v765_v5 = vmul.f32 %v2431_v27, %v731_v46  ;;  %v799_v17 = vld [vmem:[#allocation2 + $0x14] ss:$2 sm:$0xff]  ;;  %v865_v51 = vld [vmem:[#allocation2 + $0x5] ss:$2 sm:$0xff] }
  0x2b   : > { %v832_v50 = vmul.f32 %v2436_v28, %v797_v47  ;;  %v867_v52 = vld [vmem:[#allocation2 + $0x15] ss:$2 sm:$0xff]  ;;  %v645_v53 = vadd.f32 %v629_v43, %v561_v16  ;;  %v833_v54 = vmul.f32 %v2436_v28, %v799_v17  ;;  %v900_v55 = vmul.f32 %v2481_v35, %v865_v51  ;;  %v933_v57 = vld [vmem:[#allocation2 + $0x6] ss:$2 sm:$0xff]  ;;  %v935_v58 = vld [vmem:[#allocation2 + $0x16] ss:$2 sm:$0xff] }
  0x2c   : > { %v901_v56 = vmul.f32 %v2481_v35, %v867_v52  ;;  %v529_v59 = vld [vmem:[#allocation2 + $0x20] ss:$2 sm:$0xff]  ;;  %v712_v60 = vadd.f32 %v696_v41, %v644_v48  ;;  %v968_v61 = vmul.f32 %v2491_v42, %v933_v57  ;;  %v969_v62 = vmul.f32 %v2491_v42, %v935_v58  ;;  %v531_v63 = vld [vmem:[#allocation2 + $0x30] ss:$2 sm:$0xff]  ;;  %v597_v1 = vld [vmem:[#allocation2 + $0x21] ss:$2 sm:$0xff] }
  0x2d   : > { %v562_v0 = vmul.f32 %v2411_v14, %v529_v59  ;;  %v599_v12 = vld [vmem:[#allocation2 + $0x31] ss:$2 sm:$0xff]  ;;  %v713_v13 = vadd.f32 %v697_v44, %v645_v53  ;;  %v563_v18 = vmul.f32 %v2411_v14, %v531_v63  ;;  %v630_v19 = vmul.f32 %v2416_v15, %v597_v1  ;;  %v665_v22 = vld [vmem:[#allocation2 + $0x22] ss:$2 sm:$0xff]  ;;  %v667_v26 = vld [vmem:[#allocation2 + $0x32] ss:$2 sm:$0xff] }
  0x2e   : > { %v631_v21 = vmul.f32 %v2416_v15, %v599_v12  ;;  %v733_v29 = vld [vmem:[#allocation2 + $0x23] ss:$2 sm:$0xff]  ;;  %v780_v30 = vadd.f32 %v764_v49, %v712_v60  ;;  %v698_v32 = vmul.f32 %v2425_v23, %v665_v22  ;;  %v699_v33 = vmul.f32 %v2425_v23, %v667_v26  ;;  %v735_v34 = vld [vmem:[#allocation2 + $0x33] ss:$2 sm:$0xff]  ;;  %v801_v37 = vld [vmem:[#allocation2 + $0x24] ss:$2 sm:$0xff] }
  0x2f   : > { %v766_v36 = vmul.f32 %v2431_v27, %v733_v29  ;;  %v803_v38 = vld [vmem:[#allocation2 + $0x34] ss:$2 sm:$0xff]  ;;  %v781_v39 = vadd.f32 %v765_v5, %v713_v13  ;;  %v646_v40 = vadd.f32 %v630_v19, %v562_v0  ;;  %v767_v16 = vmul.f32 %v2431_v27, %v735_v34  ;;  %v869_v43 = vld [vmem:[#allocation2 + $0x25] ss:$2 sm:$0xff]  ;;  %v871_v44 = vld [vmem:[#allocation2 + $0x35] ss:$2 sm:$0xff] }
  0x30   : > { %v647_v41 = vadd.f32 %v631_v21, %v563_v18  ;;  %v937_v45 = vld [vmem:[#allocation2 + $0x26] ss:$2 sm:$0xff]  ;;  %v848_v46 = vadd.f32 %v832_v50, %v780_v30  ;;  %v834_v47 = vmul.f32 %v2436_v28, %v801_v37  ;;  %v835_v48 = vmul.f32 %v2436_v28, %v803_v38  ;;  %v939_v17 = vld [vmem:[#allocation2 + $0x36] ss:$2 sm:$0xff]  ;;  %v601_v59 = vld [vmem:[#allocation2 + $0x49] ss:$2 sm:$0xff] }
  0x31   : > { %v902_v49 = vmul.f32 %v2481_v35, %v869_v43  ;;  %v533_v51 = vld [vmem:[#allocation2 + $0x48] ss:$2 sm:$0xff]  ;;  %v535_v52 = vld [vmem:[#allocation2 + $0x58] ss:$2 sm:$0xff]  ;;  %v849_v53 = vadd.f32 %v833_v54, %v781_v39  ;;  %v714_v57 = vadd.f32 %v698_v32, %v646_v40  ;;  %v903_v58 = vmul.f32 %v2481_v35, %v871_v44  ;;  %v603_v60 = vld [vmem:[#allocation2 + $0x59] ss:$2 sm:$0xff] }
  0x32   : > { %v715_v5 = vadd.f32 %v699_v33, %v647_v41  ;;  %v669_v63 = vld [vmem:[#allocation2 + $0x4a] ss:$2 sm:$0xff]  ;;  %v916_v0 = vadd.f32 %v900_v55, %v848_v46  ;;  %v970_v50 = vmul.f32 %v2491_v42, %v937_v45  ;;  %v971_v1 = vmul.f32 %v2491_v42, %v939_v17  ;;  %v671_v13 = vld [vmem:[#allocation2 + $0x5a] ss:$2 sm:$0xff]  ;;  %v737_v26 = vld [vmem:[#allocation2 + $0x4b] ss:$2 sm:$0xff] }
  0x33   : > { %v564_v12 = vmul.f32 %v2411_v14, %v533_v51  ;;  %v917_v18 = vadd.f32 %v901_v56, %v849_v53  ;;  %v2525_v54 = vld [vmem:[%s3023_s2] ss:$0 sm:$0xff]  ;;  %v782_v19 = vadd.f32 %v766_v36, %v714_v57  ;;  %v565_v22 = vmul.f32 %v2411_v14, %v535_v52  ;;  %v739_v33 = vld [vmem:[#allocation2 + $0x5b] ss:$2 sm:$0xff]  ;;  %v805_v39 = vld [vmem:[#allocation2 + $0x4c] ss:$2 sm:$0xff] }
  0x34   : > { %v783_v21 = vadd.f32 %v767_v16, %v715_v5  ;;  %v984_v29 = vadd.f32 %v968_v61, %v916_v0  ;;  %v632_v55 = vmul.f32 %v2416_v15, %v601_v59  ;;  %v633_v30 = vmul.f32 %v2416_v15, %v603_v60  ;;  %v807_v61 = vld [vmem:[#allocation2 + $0x5c] ss:$2 sm:$0xff]  ;;  %v873_v17 = vld [vmem:[#allocation2 + $0x4d] ss:$2 sm:$0xff]  ;;  %s1921_s25 = sshll.u32 %s379_s24, 4  ;;  %s2255_s14 = smov [#allocation4]   ;;  %s2981_s25 = int_to_ptr.vmem [resolvable:$true] %s1921_s25 }
  0x35   : > { %v700_v32 = vmul.f32 %v2425_v23, %v669_v63  ;;  %v985_v34 = vadd.f32 %v969_v62, %v917_v18  ;;  %v850_v56 = vadd.f32 %v834_v47, %v782_v19  ;;  %v701_v38 = vmul.f32 %v2425_v23, %v671_v13  ;;  %v875_v62 = vld [vmem:[#allocation2 + $0x5d] ss:$2 sm:$0xff]  ;;  %v941_v53 = vld [vmem:[#allocation2 + $0x4e] ss:$2 sm:$0xff]  ;;  %v943_v63 = vld [vmem:[#allocation2 + $0x5e] ss:$2 sm:$0xff] }
  0x36   : > { %v851_v37 = vadd.f32 %v835_v48, %v783_v21  ;;  %v1007_v36 = vadd.f32 %v2525_v54, %v984_v29  ;;  %v648_v40 = vadd.f32 %v632_v55, %v564_v12  ;;  %v649_v41 = vadd.f32 %v633_v30, %v565_v22  ;;  %v537_v0 = vld [vmem:[#allocation2 + $0x68] ss:$2 sm:$0xff]  ;;  %v539_v18 = vld [vmem:[#allocation2 + $0x78] ss:$2 sm:$0xff]  ;;  %v605_v19 = vld [vmem:[#allocation2 + $0x69] ss:$2 sm:$0xff] }
  0x37   : > { %v768_v16 = vmul.f32 %v2431_v27, %v737_v26  ;;  %v1008_v43 = vadd.f32 %v2525_v54, %v985_v34  ;;  %v918_v44 = vadd.f32 %v902_v49, %v850_v56  ;;  %v769_v46 = vmul.f32 %v2431_v27, %v739_v33  ;;  %v607_v21 = vld [vmem:[#allocation2 + $0x79] ss:$2 sm:$0xff]  ;;  %v675_v55 = vld [vmem:[#allocation2 + $0x7a] ss:$2 sm:$0xff]  ;;  %s2189_s21 = scalar_lea.vmem %s2981_s25, 64  ;;  %s2193_s16 = sshll.u32 %s2255_s14, 4  ;;  %s2194_s16 = int_to_ptr.vmem [resolvable:$false] %s2193_s16 }
  0x38   : > { %v919_v45 = vadd.f32 %v903_v58, %v851_v37  ;;  %v1023_v47 = vmax.f32 %v1007_v36, 0.0  ;;  %v716_v48 = vadd.f32 %v700_v32, %v648_v40  ;;  %v717_v51 = vadd.f32 %v701_v38, %v649_v41  ;;  %v741_v30 = vld [vmem:[#allocation2 + $0x6b] ss:$2 sm:$0xff]  ;;  %v743_v37 = vld [vmem:[#allocation2 + $0x7b] ss:$2 sm:$0xff]  ;;  %p2190_p11 = scmp.ne.s32.totalorder %s2981_s25, %s2189_s21  ;;  %p2196_p0 = scmp.lt.s32.totalorder %s2981_s25, %s2194_s16 }
  0x39   : > { %v836_v52 = vmul.f32 %v2436_v28, %v805_v39  ;;  %v1024_v57 = vmax.f32 %v1008_v43, 0.0  ;;  %v986_v5 = vadd.f32 %v970_v50, %v918_v44  ;;  %v837_v60 = vmul.f32 %v2436_v28, %v807_v61  ;;  %v809_v38 = vld [vmem:[#allocation2 + $0x6c] ss:$2 sm:$0xff]  ;;  %v811_v39 = vld [vmem:[#allocation2 + $0x7c] ss:$2 sm:$0xff] }
  0x3a   : > { %v987_v59 = vadd.f32 %v971_v1, %v919_v45  ;;  %v784_v12 = vadd.f32 %v768_v16, %v716_v48  ;;  %v785_v49 = vadd.f32 %v769_v46, %v717_v51  ;;  %v904_v58 = vmul.f32 %v2481_v35, %v873_v17  ;;  %v673_v1 = vld [vmem:[#allocation2 + $0x6a] ss:$2 sm:$0xff]  ;;  %v877_v61 = vld [vmem:[#allocation2 + $0x6d] ss:$2 sm:$0xff]  ;;  %v879_v17 = vld [vmem:[#allocation2 + $0x7d] ss:$2 sm:$0xff]  ;;  %p2191_p12 = pnand %p2190_p11, %p2354_p5 }
  0x3b   : > { %v905_v13 = vmul.f32 %v2481_v35, %v875_v62  ;;  %v1039_v22 = vpack.c.bf16 %v1024_v57, %v1023_v47  ;;  %v1009_v26 = vadd.f32 %v2525_v54, %v986_v5  ;;  %v972_v50 = vmul.f32 %v2491_v42, %v941_v53  ;;  %v945_v62 = vld [vmem:[#allocation2 + $0x6e] ss:$2 sm:$0xff]  ;;  %v2587_v20 = vld [vmem:[%s2402_s29 + $0xe0] sm:$0xff] }
  0x3c   : > { %v1010_v29 = vadd.f32 %v2525_v54, %v987_v59  ;;  %v852_v32 = vadd.f32 %v836_v52, %v784_v12  ;;  %v853_v33 = vadd.f32 %v837_v60, %v785_v49  ;;  %v973_v34 = vmul.f32 %v2491_v42, %v943_v63  ;;  %v541_v60 = vld [vmem:[#allocation2 + $0x90] ss:$2 sm:$0xff]  ;;  %v609_v63 = vld [vmem:[#allocation2 + $0x91] ss:$2 sm:$0xff]  ;;  %p2192_p13 = pneg %p2191_p12 }
  0x3d   : > { %v566_v56 = vmul.f32 %v2411_v14, %v537_v0  ;;  %2062 = vmatprep.mubr.msk.bf16.mxu0 %vm491_vm1, %v1039_v22  ;;  %v1025_v36 = vmax.f32 %v1009_v26, 0.0  ;;  %v567_v41 = vmul.f32 %v2411_v14, %v539_v18  ;;  %v634_v16 = vmul.f32 %v2416_v15, %v605_v19  ;;  %v677_v0 = vld [vmem:[#allocation2 + $0x92] ss:$2 sm:$0xff]  ;;  %v745_v26 = vld [vmem:[#allocation2 + $0x93] ss:$2 sm:$0xff] }
  0x3e   : > { %v1026_v40 = vmax.f32 %v1010_v29, 0.0  ;;  %v920_v43 = vadd.f32 %v904_v58, %v852_v32  ;;  %v921_v44 = vadd.f32 %v905_v13, %v853_v33  ;;  %v635_v45 = vmul.f32 %v2416_v15, %v607_v21  ;;  %v947_v13 = vld [vmem:[#allocation2 + $0x7e] ss:$2 sm:$0xff] }
  0x3f   : > { %v702_v46 = vmul.f32 %v2425_v23, %v673_v1  ;;  %v650_v48 = vadd.f32 %v634_v16, %v566_v56  ;;  %v703_v51 = vmul.f32 %v2425_v23, %v675_v55  ;;  %v770_v52 = vmul.f32 %v2431_v27, %v741_v30  ;;  %v408_v30 = vld [vmem:[%s2402_s29 + $0xb0] sm:$0xff] }
  0x40   : > { %v1040_v47 = vpack.c.bf16 %v1026_v40, %v1025_v36  ;;  %v988_v53 = vadd.f32 %v972_v50, %v920_v43  ;;  %v989_v57 = vadd.f32 %v973_v34, %v921_v44  ;;  %v651_v5 = vadd.f32 %v635_v45, %v567_v41 }
  0x41   : > { %v771_v59 = vmul.f32 %v2431_v27, %v743_v37  ;;  %v718_v12 = vadd.f32 %v702_v46, %v650_v48  ;;  %v838_v49 = vmul.f32 %v2436_v28, %v809_v38  ;;  %v839_v58 = vmul.f32 %v2436_v28, %v811_v39  ;;  %v813_v37 = vld [vmem:[#allocation2 + $0x94] ss:$2 sm:$0xff] }
  0x42   : > { %2063 = vmatmul.mubr.msk.bf16.vlgmr.msra.gmra.mrb[0].mxu0 %vm491_vm1, %v1040_v47  ;;  %v1011_v18 = vadd.f32 %v2525_v54, %v988_v53  ;;  %v1012_v19 = vadd.f32 %v2525_v54, %v989_v57  ;;  %v719_v21 = vadd.f32 %v703_v51, %v651_v5  ;;  %v906_v22 = vmul.f32 %v2481_v35, %v877_v61  ;;  %v409_v38 = vld [vmem:[%s2402_s29 + $0xb8] sm:$0xff]  ;;  %v412_v47 = vld [vmem:[%s2402_s29 + $0xd0] sm:$0xff] }
  0x43   : > { %v786_v29 = vadd.f32 %v770_v52, %v718_v12  ;;  %v907_v50 = vmul.f32 %v2481_v35, %v879_v17  ;;  %v974_v1 = vmul.f32 %v2491_v42, %v945_v62  ;;  %v469_v55 = vmin.f32 %v437_v24, 3.0  ;;  %v410_v24 = vld [vmem:[%s2402_s29 + $0xc0] sm:$0xff] }
  0x44   : > { %v1027_v32 = vmax.f32 %v1011_v18, 0.0  ;;  %v1028_v33 = vmax.f32 %v1012_v19, 0.0  ;;  %v787_v34 = vadd.f32 %v771_v59, %v719_v21  ;;  %v470_v56 = vmin.f32 %v438_v25, 3.0  ;;  %v881_v53 = vld [vmem:[#allocation2 + $0x95] ss:$2 sm:$0xff] }
  0x45   : > { %v854_v39 = vadd.f32 %v838_v49, %v786_v29  ;;  %511 = vst.msk [vmem:[#allocation2 + $0xab] sm:$0xff] %vm491_vm1, %v469_v55  ;;  %v568_v36 = vmul.f32 %v2411_v14, %v541_v60  ;;  %v636_v40 = vmul.f32 %v2416_v15, %v609_v63  ;;  %v704_v2 = vmul.f32 %v2425_v23, %v677_v0  ;;  %v949_v12 = vld [vmem:[#allocation2 + $0x96] ss:$2 sm:$0xff] }
  0x46   : > { %v1041_v41 = vpack.c.bf16 %v1028_v33, %v1027_v32  ;;  %v855_v16 = vadd.f32 %v839_v58, %v787_v34  ;;  %v975_v61 = vmul.f32 %v2491_v42, %v947_v13  ;;  %512 = vst.msk [vmem:[#allocation2 + $0xb3] sm:$0xff] %vm491_vm1, %v470_v56  ;;  %v772_v44 = vmul.f32 %v2431_v27, %v745_v26  ;;  %v2584_v49 = vld [vmem:[%s2402_s29 + $0xd8] sm:$0xff] }
  0x47   : > { %v922_v25 = vadd.f32 %v906_v22, %v854_v39  ;;  %v652_v43 = vadd.f32 %v636_v40, %v568_v36  ;;  %v440_v46 = vmax.f32 %v408_v30, -2.0  ;;  %v441_v17 = vmax.f32 %v409_v38, -2.0 }
  0x48   : > { %2066 = vmatprep.mubr.msk.bf16.mxu0 %vm491_vm1, %v1041_v41  ;;  %v923_v45 = vadd.f32 %v907_v50, %v855_v16  ;;  %v471_v62 = vmin.f32 %v439_v31, 3.0  ;;  %v840_v52 = vmul.f32 %v2436_v28, %v813_v37  ;;  %v442_v60 = vmax.f32 %v410_v24, -2.0 }
  0x49   : > { %v990_v48 = vadd.f32 %v974_v1, %v922_v25  ;;  %v720_v51 = vadd.f32 %v704_v2, %v652_v43  ;;  %v472_v5 = vmin.f32 %v440_v46, 3.0  ;;  %v473_v59 = vmin.f32 %v441_v17, 3.0 }
  0x4a   : > { %v991_v57 = vadd.f32 %v975_v61, %v923_v45  ;;  %513 = vst.msk [vmem:[#allocation2 + $0xbb] sm:$0xff] %vm491_vm1, %v471_v62  ;;  %v443_v31 = vmax.f32 %v411_v11, -2.0  ;;  %v444_v58 = vmax.f32 %v412_v47, -2.0  ;;  %v908_v22 = vmul.f32 %v2481_v35, %v881_v53 }
  0x4b   : > { %v1013_v63 = vadd.f32 %v2525_v54, %v990_v48  ;;  %v788_v0 = vadd.f32 %v772_v44, %v720_v51  ;;  %514 = vst.msk [vmem:[#allocation2 + $0xc3] sm:$0xff] %vm491_vm1, %v472_v5  ;;  %515 = vst.msk [vmem:[#allocation2 + $0xcb] sm:$0xff] %vm491_vm1, %v473_v59  ;;  %v976_v34 = vmul.f32 %v2491_v42, %v949_v12  ;;  %v445_v56 = vmax.f32 %v2584_v49, -2.0 }
  0x4c   : > { %v1014_v13 = vadd.f32 %v2525_v54, %v991_v57  ;;  %v543_v18 = vld [vmem:[#allocation2 + $0xa0] ss:$2 sm:$0xff]  ;;  %v611_v19 = vld [vmem:[#allocation2 + $0xa1] ss:$2 sm:$0xff]  ;;  %v446_v39 = vmax.f32 %v2587_v20, -2.0  ;;  %v474_v36 = vmin.f32 %v442_v60, 3.0 }
  0x4d   : > { %v679_v21 = vld [vmem:[#allocation2 + $0xa2] ss:$2 sm:$0xff]  ;;  %v1029_v26 = vmax.f32 %v1013_v63, 0.0  ;;  %v569_v29 = vmul.f32 %v2411_v14, %v543_v18  ;;  %v637_v50 = vmul.f32 %v2416_v15, %v611_v19  ;;  %v747_v55 = vld [vmem:[#allocation2 + $0xa3] ss:$2 sm:$0xff]  ;;  %v856_v33 = vadd.f32 %v840_v52, %v788_v0 }
  0x4e   : > { %v705_v1 = vmul.f32 %v2425_v23, %v679_v21  ;;  %v1030_v30 = vmax.f32 %v1014_v13, 0.0  ;;  %v815_v32 = vld [vmem:[#allocation2 + $0xa4] ss:$2 sm:$0xff]  ;;  %v773_v38 = vmul.f32 %v2431_v27, %v747_v55  ;;  %v883_v2 = vld [vmem:[#allocation2 + $0xa5] ss:$2 sm:$0xff]  ;;  %v475_v41 = vmin.f32 %v443_v31, 3.0 }
  0x4f   : > { %v653_v37 = vadd.f32 %v637_v50, %v569_v29  ;;  %v924_v24 = vadd.f32 %v908_v22, %v856_v33  ;;  %v476_v16 = vmin.f32 %v444_v58, 3.0  ;;  %v841_v11 = vmul.f32 %v2436_v28, %v815_v32  ;;  %516 = vst.msk [vmem:[#allocation2 + $0xdb] sm:$0xff] %vm491_vm1, %v474_v36  ;;  %v951_v45 = vld [vmem:[#allocation2 + $0xa6] ss:$2 sm:$0xff] }
  0x50   : > { %v1042_v40 = vpack.c.bf16 %v1030_v30, %v1029_v26  ;;  %517 = vst.msk [vmem:[#allocation2 + $0xe3] sm:$0xff] %vm491_vm1, %v475_v41  ;;  %v909_v52 = vmul.f32 %v2481_v35, %v883_v2  ;;  %v977_v13 = vmul.f32 %v2491_v42, %v951_v45  ;;  %v478_v36 = vmin.f32 %v446_v39, 3.0  ;;  %v416_v45 = vld [vmem:[%s2402_s29 + $0xf0] sm:$0xff] }
  0x51   : > { %v721_v61 = vadd.f32 %v705_v1, %v653_v37  ;;  %v545_v25 = vld [vmem:[#allocation2 + $0xb0] ss:$2 sm:$0xff]  ;;  %v613_v43 = vld [vmem:[#allocation2 + $0xb1] ss:$2 sm:$0xff]  ;;  %518 = vst.msk [vmem:[#allocation2 + $0xeb] sm:$0xff] %vm491_vm1, %v476_v16  ;;  %v992_v53 = vadd.f32 %v976_v34, %v924_v24 }
  0x52   : > { %v681_v44 = vld [vmem:[#allocation2 + $0xb2] ss:$2 sm:$0xff]  ;;  %2067 = vmatmul.mubr.msk.bf16.gmra.mrb[4].mxu0 %vm491_vm1, %v1042_v40  ;;  %v570_v46 = vmul.f32 %v2411_v14, %v545_v25  ;;  %v638_v17 = vmul.f32 %v2416_v15, %v613_v43  ;;  %v749_v47 = vld [vmem:[#allocation2 + $0xb3] ss:$2 sm:$0xff]  ;;  %v683_v59 = vld [vmem:[#allocation2 + $0xc2] ss:$2 sm:$0xff] }
  0x53   : > { %v706_v62 = vmul.f32 %v2425_v23, %v681_v44  ;;  %v817_v48 = vld [vmem:[#allocation2 + $0xb4] ss:$2 sm:$0xff]  ;;  %v789_v51 = vadd.f32 %v773_v38, %v721_v61  ;;  %v615_v5 = vld [vmem:[#allocation2 + $0xc1] ss:$2 sm:$0xff]  ;;  %v774_v49 = vmul.f32 %v2431_v27, %v749_v47  ;;  %v819_v20 = vld [vmem:[#allocation2 + $0xc4] ss:$2 sm:$0xff]  ;;  %v707_v18 = vmul.f32 %v2425_v23, %v683_v59 }
  0x54   : > { %v547_v57 = vld [vmem:[#allocation2 + $0xc0] ss:$2 sm:$0xff]  ;;  %v639_v63 = vmul.f32 %v2416_v15, %v615_v5  ;;  %v654_v0 = vadd.f32 %v638_v17, %v570_v46  ;;  %v751_v12 = vld [vmem:[#allocation2 + $0xc3] ss:$2 sm:$0xff]  ;;  %v842_v26 = vmul.f32 %v2436_v28, %v817_v48  ;;  %v1015_v55 = vadd.f32 %v2525_v54, %v992_v53  ;;  %520 = vst.msk [vmem:[#allocation2 + $0xfb] sm:$0xff] %vm491_vm1, %v478_v36  ;;  %v417_v48 = vld [vmem:[%s2402_s29 + $0xf8] sm:$0xff] }
  0x55   : > { %v571_v60 = vmul.f32 %v2411_v14, %v547_v57  ;;  %v885_v31 = vld [vmem:[#allocation2 + $0xb5] ss:$2 sm:$0xff]  ;;  %v857_v58 = vadd.f32 %v841_v11, %v789_v51  ;;  %v775_v22 = vmul.f32 %v2431_v27, %v751_v12  ;;  %v887_v29 = vld [vmem:[#allocation2 + $0xc5] ss:$2 sm:$0xff]  ;;  %v953_v50 = vld [vmem:[#allocation2 + $0xb6] ss:$2 sm:$0xff]  ;;  %v843_v30 = vmul.f32 %v2436_v28, %v819_v20 }
  0x56   : > { %v722_v21 = vadd.f32 %v706_v62, %v654_v0  ;;  %v910_v32 = vmul.f32 %v2481_v35, %v885_v31  ;;  %v955_v37 = vld [vmem:[#allocation2 + $0xc6] ss:$2 sm:$0xff]  ;;  %v477_v38 = vmin.f32 %v445_v56, 3.0  ;;  %v911_v2 = vmul.f32 %v2481_v35, %v887_v29 }
  0x57   : > { %v655_v19 = vadd.f32 %v639_v63, %v571_v60  ;;  %v925_v1 = vadd.f32 %v909_v52, %v857_v58  ;;  %v978_v24 = vmul.f32 %v2491_v42, %v953_v50  ;;  %v549_v41 = vld [vmem:[#allocation2 + $0xd8] ss:$2 sm:$0xff]  ;;  %v617_v16 = vld [vmem:[#allocation2 + $0xd9] ss:$2 sm:$0xff]  ;;  %v415_v44 = vld [vmem:[%s2402_s29 + $0xe8] sm:$0xff]  ;;  %v1031_v17 = vmax.f32 %v1015_v55, 0.0 }
  0x58   : > { %v790_v34 = vadd.f32 %v774_v49, %v722_v21  ;;  %v685_v61 = vld [vmem:[#allocation2 + $0xda] ss:$2 sm:$0xff]  ;;  %519 = vst.msk [vmem:[#allocation2 + $0xf3] sm:$0xff] %vm491_vm1, %v477_v38  ;;  %v572_v43 = vmul.f32 %v2411_v14, %v549_v41  ;;  %v640_v56 = vmul.f32 %v2416_v15, %v617_v16  ;;  %v753_v39 = vld [vmem:[#allocation2 + $0xdb] ss:$2 sm:$0xff]  ;;  %v979_v62 = vmul.f32 %v2491_v42, %v955_v37  ;;  %s2195_s29 = scalar_lea.vmem %s2194_s16, 128 }
  0x59   : > { %v723_v33 = vadd.f32 %v707_v18, %v655_v19  ;;  %v993_v40 = vadd.f32 %v977_v13, %v925_v1  ;;  %v708_v47 = vmul.f32 %v2425_v23, %v685_v61  ;;  %v776_v57 = vmul.f32 %v2431_v27, %v753_v39  ;;  %v821_v5 = vld [vmem:[#allocation2 + $0xdc] ss:$2 sm:$0xff]  ;;  %v889_v20 = vld [vmem:[#allocation2 + $0xdd] ss:$2 sm:$0xff]  ;;  %p2197_p1 = scmp.lt.s32.totalorder %s2195_s29, %s2189_s21 }
  0x5a   : > { %v858_v25 = vadd.f32 %v842_v26, %v790_v34  ;;  %v656_v53 = vadd.f32 %v640_v56, %v572_v43  ;;  %v447_v60 = vmax.f32 %v415_v44, -2.0  ;;  %v448_v63 = vmax.f32 %v416_v45, -2.0  ;;  %v957_v29 = vld [vmem:[#allocation2 + $0xde] ss:$2 sm:$0xff] }
  0x5b   : > { %v791_v11 = vadd.f32 %v775_v22, %v723_v33  ;;  %v1016_v46 = vadd.f32 %v2525_v54, %v993_v40  ;;  %v449_v31 = vmax.f32 %v417_v48, -2.0  ;;  %v844_v13 = vmul.f32 %v2436_v28, %v821_v5  ;;  %p2198_p2 = por %p2197_p1, %p2196_p0 }
  0x5c   : > { %v926_v52 = vadd.f32 %v910_v32, %v858_v25  ;;  %v724_v49 = vadd.f32 %v708_v47, %v656_v53  ;;  %v479_v18 = vmin.f32 %v447_v60, 3.0  ;;  %v480_v19 = vmin.f32 %v448_v63, 3.0 }
  0x5d   : > { %v859_v51 = vadd.f32 %v843_v30, %v791_v11  ;;  %v1032_v59 = vmax.f32 %v1016_v46, 0.0  ;;  %v481_v50 = vmin.f32 %v449_v31, 3.0  ;;  %v912_v32 = vmul.f32 %v2481_v35, %v889_v20  ;;  %p2199_p3 = pnand %p2198_p2, %p2192_p13 }
  0x5e   : > { %v994_v12 = vadd.f32 %v978_v24, %v926_v52  ;;  %v792_v26 = vadd.f32 %v776_v57, %v724_v49  ;;  %521 = vst.msk [vmem:[#allocation2 + $0x103] sm:$0xff] %vm491_vm1, %v479_v18  ;;  %522 = vst.msk [vmem:[#allocation2 + $0x10b] sm:$0xff] %vm491_vm1, %v480_v19  ;;  %v980_v11 = vmul.f32 %v2491_v42, %v957_v29 }
  0x5f   : > { %v927_v0 = vadd.f32 %v911_v2, %v859_v51  ;;  %v1043_v58 = vpack.c.bf16 %v1032_v59, %v1031_v17  ;;  %v551_v1 = vld [vmem:[#allocation2 + $0xe8] ss:$2 sm:$0xff]  ;;  %v619_v55 = vld [vmem:[#allocation2 + $0xe9] ss:$2 sm:$0xff]  ;;  %523 = vst.msk [vmem:[#allocation2 + $0x113] sm:$0xff] %vm491_vm1, %v481_v50 }
  0x60   : > { %v1017_v22 = vadd.f32 %v2525_v54, %v994_v12  ;;  %v687_v30 = vld [vmem:[#allocation2 + $0xea] ss:$2 sm:$0xff]  ;;  %v573_v37 = vmul.f32 %v2411_v14, %v551_v1  ;;  %v641_v38 = vmul.f32 %v2416_v15, %v619_v55  ;;  %v755_v36 = vld [vmem:[#allocation2 + $0xeb] ss:$2 sm:$0xff]  ;;  %v860_v24 = vadd.f32 %v844_v13, %v792_v26 }
  0x61   : > { %v995_v21 = vadd.f32 %v979_v62, %v927_v0  ;;  %2070 = vmatprep.mubr.msk.bf16.mxu0 %vm491_vm1, %v1043_v58  ;;  %v709_v40 = vmul.f32 %v2425_v23, %v687_v30  ;;  %v823_v2 = vld [vmem:[#allocation2 + $0xec] ss:$2 sm:$0xff]  ;;  %v777_v61 = vmul.f32 %v2431_v27, %v755_v36  ;;  %v891_v25 = vld [vmem:[#allocation2 + $0xed] ss:$2 sm:$0xff] }
  0x62   : > { %v1033_v34 = vmax.f32 %v1017_v22, 0.0  ;;  %v657_v16 = vadd.f32 %v641_v38, %v573_v37  ;;  %v928_v43 = vadd.f32 %v912_v32, %v860_v24  ;;  %v845_v44 = vmul.f32 %v2436_v28, %v823_v2  ;;  %v959_v45 = vld [vmem:[#allocation2 + $0xee] ss:$2 sm:$0xff] }
  0x63   : > { %v1018_v33 = vadd.f32 %v2525_v54, %v995_v21  ;;  %v913_v17 = vmul.f32 %v2481_v35, %v891_v25  ;;  %v981_v52 = vmul.f32 %v2491_v42, %v959_v45 }
  0x64   : > { %v725_v39 = vadd.f32 %v709_v40, %v657_v16  ;;  %v996_v62 = vadd.f32 %v980_v11, %v928_v43 }
  0x65   : > { %v1034_v41 = vmax.f32 %v1018_v33, 0.0  ;;  %v553_v47 = vld [vmem:[#allocation2 + $0xf8] ss:$2 sm:$0xff]  ;;  %v621_v48 = vld [vmem:[#allocation2 + $0xf9] ss:$2 sm:$0xff] }
  0x66   : > { %v793_v46 = vadd.f32 %v777_v61, %v725_v39  ;;  %v689_v51 = vld [vmem:[#allocation2 + $0xfa] ss:$2 sm:$0xff]  ;;  %v574_v57 = vmul.f32 %v2411_v14, %v553_v47  ;;  %v623_v5 = vld [vmem:[#allocation2 + $0x109] ss:$2 sm:$0xff]  ;;  %v642_v59 = vmul.f32 %v2416_v15, %v621_v48  ;;  %v691_v60 = vld [vmem:[#allocation2 + $0x10a] ss:$2 sm:$0xff]  ;;  %v1019_v26 = vadd.f32 %v2525_v54, %v996_v62 }
  0x67   : > { %v1044_v56 = vpack.c.bf16 %v1034_v41, %v1033_v34  ;;  %v555_v53 = vld [vmem:[#allocation2 + $0x108] ss:$2 sm:$0xff]  ;;  %v710_v63 = vmul.f32 %v2425_v23, %v689_v51  ;;  %v643_v49 = vmul.f32 %v2416_v15, %v623_v5  ;;  %v711_v20 = vmul.f32 %v2425_v23, %v691_v60  ;;  %v757_v31 = vld [vmem:[#allocation2 + $0xfb] ss:$2 sm:$0xff]  ;;  %v759_v58 = vld [vmem:[#allocation2 + $0x10b] ss:$2 sm:$0xff] }
  0x68   : > { %v861_v0 = vadd.f32 %v845_v44, %v793_v46  ;;  %v575_v12 = vmul.f32 %v2411_v14, %v555_v53  ;;  %v825_v13 = vld [vmem:[#allocation2 + $0xfc] ss:$2 sm:$0xff]  ;;  %v658_v18 = vadd.f32 %v642_v59, %v574_v57  ;;  %v778_v19 = vmul.f32 %v2431_v27, %v757_v31  ;;  %v827_v21 = vld [vmem:[#allocation2 + $0x10c] ss:$2 sm:$0xff]  ;;  %v893_v1 = vld [vmem:[#allocation2 + $0xfd] ss:$2 sm:$0xff] }
  0x69   : > { %2071 = vmatmul.mubr.msk.bf16.gmra.mrb[8].mxu0 %vm491_vm1, %v1044_v56  ;;  %v779_v50 = vmul.f32 %v2431_v27, %v759_v58  ;;  %v846_v14 = vmul.f32 %v2436_v28, %v825_v13  ;;  %v895_v15 = vld [vmem:[#allocation2 + $0x10d] ss:$2 sm:$0xff]  ;;  %v847_v32 = vmul.f32 %v2436_v28, %v827_v21  ;;  %v961_v33 = vld [vmem:[#allocation2 + $0xfe] ss:$2 sm:$0xff]  ;;  %v914_v37 = vmul.f32 %v2481_v35, %v893_v1  ;;  %v963_v38 = vld [vmem:[#allocation2 + $0x10e] ss:$2 sm:$0xff] }
  0x6a   : > { %v929_v22 = vadd.f32 %v913_v17, %v861_v0  ;;  %v659_v29 = vadd.f32 %v643_v49, %v575_v12  ;;  %v726_v55 = vadd.f32 %v710_v63, %v658_v18  ;;  %v1035_v40 = vmax.f32 %v1019_v26, 0.0  ;;  %v2174_v62 = vld [vmem:[%s3028_s7 + $0x8] sm:$0xff]   ;;  %v2176_v47 = vld [vmem:[%s3028_s7 + $0x18] sm:$0xff]   ;;  %v2177_v48 = vld [vmem:[%s3028_s7 + $0x20] sm:$0xff]  }
  0x6b   : > { %v915_v27 = vmul.f32 %v2481_v35, %v895_v15  ;;  %v982_v41 = vmul.f32 %v2491_v42, %v961_v33  ;;  %v983_v11 = vmul.f32 %v2491_v42, %v963_v38  ;;  %v2173_v42 = vld [vmem:[%s3028_s7] sm:$0xff]   ;;  %v2178_v51 = vld [vmem:[%s3028_s7 + $0x28] sm:$0xff]   ;;  %v2180_v53 = vld [vmem:[%s3028_s7 + $0x38] sm:$0xff]  }
  0x6c   : > { %v997_v30 = vadd.f32 %v981_v52, %v929_v22  ;;  %v727_v23 = vadd.f32 %v711_v20, %v659_v29  ;;  %v794_v34 = vadd.f32 %v778_v19, %v726_v55  ;;  %2078 = vmatprep.subr.bf16.mxu1 %v2173_v42  ;;  %v2179_v52 = vld [vmem:[%s3028_s7 + $0x30] sm:$0xff]   ;;  %v2696_v57 = vld [vmem:[%s3025_s4] ss:$0 sm:$0xff] }
  0x6d   : > { %2079 = vmatpush3.bf16.msra.mxu1 %v2173_v42  ;;  %v1231_v19 = vld [vmem:[%s3026_s5] sm:$0x1f] }
  0x6e   : > { %v1020_v36 = vadd.f32 %v2525_v54, %v997_v30  ;;  %v795_v2 = vadd.f32 %v779_v50, %v727_v23  ;;  %v862_v24 = vadd.f32 %v846_v14, %v794_v34  ;;  %2080 = vmatprep.subr.bf16.mxu1 %v2174_v62  ;;  %v2719_v21 = vrot.slane %v1231_v19, %v558_v6 }
  0x6f   : > { %v2723_v22 = vrot.slane %v1231_v19, %v626_v7  ;;  %v2727_v26 = vrot.slane %v1231_v19, %v694_v8  ;;  %v2731_v1 = vrot.slane %v1231_v19, %v762_v9  ;;  %v2735_v55 = vrot.slane %v1231_v19, %v830_v10 }
  0x70   : > { %v1036_v16 = vmax.f32 %v1020_v36, 0.0  ;;  %v863_v61 = vadd.f32 %v847_v32, %v795_v2  ;;  %v930_v25 = vadd.f32 %v914_v37, %v862_v24 }
  0x71   : > { %2081 = vmatpush3.bf16.msra.mxu1 %v2174_v62 }
  0x72   : > { %v1045_v28 = vpack.c.bf16 %v1036_v16, %v1035_v40  ;;  %v931_v43 = vadd.f32 %v915_v27, %v863_v61  ;;  %v998_v56 = vadd.f32 %v982_v41, %v930_v25 }
  0x74   : > { %2074 = vmatprep.mubr.msk.bf16.mxu0 %vm491_vm1, %v1045_v28  ;;  %v999_v39 = vadd.f32 %v983_v11, %v931_v43  ;;  %v1021_v44 = vadd.f32 %v2525_v54, %v998_v56 }
  0x76   : > { %v1022_v45 = vadd.f32 %v2525_v54, %v999_v39  ;;  %v1037_v46 = vmax.f32 %v1021_v44, 0.0  ;;  %v2175_v54 = vld [vmem:[%s3028_s7 + $0x10] sm:$0xff]  }
  0x77   : > { %2082 = vmatprep.subr.bf16.mxu1 %v2175_v54 }
  0x78   : > { %v1038_v35 = vmax.f32 %v1022_v45, 0.0  ;;  %2083 = vmatpush3.bf16.msra.mxu1 %v2175_v54 }
  0x79   : > { %2084 = vmatprep.subr.bf16.mxu1 %v2176_v47 }
  0x7a   : > { %v1046_v17 = vpack.c.bf16 %v1038_v35, %v1037_v46 }
  0x7c   : > { %2075 = vmatmul.mubr.msk.bf16.gmra.mrb[12].mxu0 %vm491_vm1, %v1046_v17  ;;  %2085 = vmatpush3.bf16.msra.mxu1 %v2176_v47 }
  0x7d   : > { %2086 = vmatprep.subr.bf16.mxu1 %v2177_v48  ;;  %2126 = vmatprep.mubr.msk.bf16.mxu0 %vm2254_vm2, %v2253_v4 }
  0x80   : > { %2087 = vmatpush3.bf16.msra.mxu1 %v2177_v48 }
  0x81   : > { %2088 = vmatprep.subr.bf16.mxu1 %v2178_v51 }
  0x84   : > { %2089 = vmatpush3.bf16.msra.mxu1 %v2178_v51 }
  0x85   : > { %2090 = vmatprep.subr.bf16.mxu1 %v2179_v52 }
  0x88   : > { %2091 = vmatpush3.bf16.msra.mxu1 %v2179_v52 }
  0x89   : > { %2092 = vmatprep.subr.bf16.mxu1 %v2180_v53 }
  0x8c   : > { %2093 = vmatpush3.bf16.msra.mxu1 %v2180_v53 }
 0x115   : > { %v2064_v5 = vpop.f32.mrb[0].mxu0 }
 0x116   : > { %v1137_v59 = vadd.f32 %v2064_v5, %v2696_v57  ;;  %v1128_v60 = vpop.f32.mrb[1].mxu0 }
 0x117   : > { %v1129_v63 = vadd.f32 %v2696_v57, %v1128_v60  ;;  %v2065_v0 = vpop.f32.mrb[2].mxu0 }
 0x118   : > { %v2700_v12 = vmax.f32 %v1137_v59, 0.0  ;;  %v1140_v49 = vadd.f32 %v2065_v0, %v2696_v57  ;;  %v1131_v20 = vpop.f32.mrb[3].mxu0  ;;  %v2768_v0 = vld [vmem:[%s3027_s6] ss:$0 sm:$0xff] }
 0x119   : > { %v2703_v31 = vmax.f32 %v1129_v63, 0.0  ;;  %v1132_v58 = vadd.f32 %v2696_v57, %v1131_v20 }
 0x11a   : > { %1217 = vst [vmem:[#allocation3 + $0x12] sm:$0xff] %v2700_v12  ;;  %v2707_v13 = vmax.f32 %v1140_v49, 0.0  ;;  %v1358_v8 = vmul.f32 %v2727_v26, %v2700_v12 }
 0x11b   : > { %1215 = vst [vmem:[#allocation3 + $0x2] sm:$0xff] %v2703_v31  ;;  %v2710_v18 = vmax.f32 %v1132_v58, 0.0  ;;  %v1356_v32 = vmul.f32 %v2727_v26, %v2703_v31 }
 0x11c   : > { %1218 = vst [vmem:[#allocation3 + $0x1a] sm:$0xff] %v2707_v13  ;;  %v1359_v10 = vmul.f32 %v2727_v26, %v2707_v13 }
 0x11d   : > { %1216 = vst [vmem:[#allocation3 + $0xa] sm:$0xff] %v2710_v18  ;;  %v1357_v36 = vmul.f32 %v2727_v26, %v2710_v18 }
 0x122   : > { %v1232_v29 = vld [vmem:[#allocation3] sm:$0xff] }
 0x123   : > { %v1284_v50 = vld [vmem:[#allocation3 + $0x1] sm:$0xff]  ;;  %v1252_v6 = vmul.f32 %v2719_v21, %v1232_v29  ;;  %v1235_v7 = vld [vmem:[#allocation3 + $0x18] sm:$0xff] }
 0x124   : > { %v1304_v14 = vmul.f32 %v2723_v22, %v1284_v50  ;;  %v1287_v15 = vld [vmem:[#allocation3 + $0x19] sm:$0xff]  ;;  %v1233_v30 = vld [vmem:[#allocation3 + $0x8] sm:$0xff]  ;;  %v1255_v33 = vmul.f32 %v2719_v21, %v1235_v7  ;;  %v1234_v61 = vld [vmem:[#allocation3 + $0x10] sm:$0xff] }
 0x125   : > { %v1285_v23 = vld [vmem:[#allocation3 + $0x9] sm:$0xff]  ;;  %v1307_v3 = vmul.f32 %v2723_v22, %v1287_v15  ;;  %v1253_v34 = vmul.f32 %v2719_v21, %v1233_v30  ;;  %v2068_v27 = vpop.f32.mrb[4].mxu0  ;;  %v1286_v11 = vld [vmem:[#allocation3 + $0x11] sm:$0xff]  ;;  %v1391_v28 = vld [vmem:[#allocation3 + $0x1b] sm:$0xff]  ;;  %v1254_v45 = vmul.f32 %v2719_v21, %v1234_v61 }
 0x126   : > { %v1388_v9 = vld [vmem:[#allocation3 + $0x3] sm:$0xff]  ;;  %v1305_v37 = vmul.f32 %v2723_v22, %v1285_v23  ;;  %v1320_v38 = vadd.f32 %v1304_v14, %v1252_v6  ;;  %v1389_v40 = vld [vmem:[#allocation3 + $0xb] sm:$0xff]  ;;  %v1153_v43 = vadd.f32 %v2068_v27, %v2696_v57  ;;  %v1144_v56 = vpop.f32.mrb[5].mxu0  ;;  %v1306_v42 = vmul.f32 %v2723_v22, %v1286_v11  ;;  %v1390_v5 = vld [vmem:[#allocation3 + $0x13] sm:$0xff] }
 0x127   : > { %v1440_v2 = vld [vmem:[#allocation3 + $0x4] sm:$0xff]  ;;  %v1408_v24 = vmul.f32 %v2731_v1, %v1388_v9  ;;  %v1409_v41 = vmul.f32 %v2731_v1, %v1389_v40  ;;  %v1323_v25 = vadd.f32 %v1307_v3, %v1255_v33  ;;  %v1145_v46 = vadd.f32 %v2696_v57, %v1144_v56  ;;  %v2069_v35 = vpop.f32.mrb[6].mxu0  ;;  %v1441_v17 = vld [vmem:[#allocation3 + $0xc] sm:$0xff]  ;;  %v1443_v59 = vld [vmem:[#allocation3 + $0x1c] sm:$0xff] }
 0x128   : > { %v1460_v16 = vmul.f32 %v2735_v55, %v1440_v2  ;;  %v1321_v39 = vadd.f32 %v1305_v37, %v1253_v34  ;;  %v1372_v44 = vadd.f32 %v1356_v32, %v1320_v38  ;;  %v1411_v54 = vmul.f32 %v2731_v1, %v1391_v28  ;;  %v1147_v51 = vpop.f32.mrb[7].mxu0  ;;  %v1442_v6 = vld [vmem:[#allocation3 + $0x14] sm:$0xff] }
 0x129   : > { %v1375_v62 = vadd.f32 %v1359_v10, %v1323_v25  ;;  %v2759_v47 = vmax.f32 %v1153_v43, 0.0  ;;  %v1156_v48 = vadd.f32 %v2069_v35, %v2696_v57  ;;  %v2762_v60 = vmax.f32 %v1145_v46, 0.0 }
 0x12a   : > { %v1373_v52 = vadd.f32 %v1357_v36, %v1321_v39  ;;  %v1424_v53 = vadd.f32 %v1408_v24, %v1372_v44  ;;  %v1148_v63 = vadd.f32 %v2696_v57, %v1147_v51  ;;  %v1322_v49 = vadd.f32 %v1306_v42, %v1254_v45 }
 0x12b   : > { %v1427_v20 = vadd.f32 %v1411_v54, %v1375_v62  ;;  %1221 = vst [vmem:[#allocation3 + $0x3a] sm:$0xff] %v2759_v47  ;;  %v2771_v58 = vmax.f32 %v1156_v48, 0.0  ;;  %v1461_v29 = vmul.f32 %v2735_v55, %v1441_v17  ;;  %1219 = vst [vmem:[#allocation3 + $0x2a] sm:$0xff] %v2762_v60  ;;  %v1410_v15 = vmul.f32 %v2731_v1, %v1390_v5 }
 0x12c   : > { %v1425_v19 = vadd.f32 %v1409_v41, %v1373_v52  ;;  %v1476_v50 = vadd.f32 %v1460_v16, %v1424_v53  ;;  %v2775_v14 = vmax.f32 %v1148_v63, 0.0  ;;  %v1374_v7 = vadd.f32 %v1358_v8, %v1322_v49 }
 0x12d   : > { %v1463_v30 = vmul.f32 %v2735_v55, %v1443_v59  ;;  %1222 = vst [vmem:[#allocation3 + $0x42] sm:$0xff] %v2771_v58  ;;  %v1462_v33 = vmul.f32 %v2735_v55, %v1442_v6  ;;  %v1360_v56 = vmul.f32 %v2727_v26, %v2762_v60 }
 0x12e   : > { %v1477_v23 = vadd.f32 %v1461_v29, %v1425_v19  ;;  %v1499_v32 = vadd.f32 %v2768_v0, %v1476_v50  ;;  %1220 = vst [vmem:[#allocation3 + $0x32] sm:$0xff] %v2775_v14  ;;  %v1426_v9 = vadd.f32 %v1410_v15, %v1374_v7  ;;  %v1361_v54 = vmul.f32 %v2727_v26, %v2775_v14 }
 0x12f   : > { %v1479_v3 = vadd.f32 %v1463_v30, %v1427_v20  ;;  %v1362_v7 = vmul.f32 %v2727_v26, %v2759_v47  ;;  %v1363_v15 = vmul.f32 %v2727_v26, %v2771_v58 }
 0x130   : > { %v1500_v10 = vadd.f32 %v2768_v0, %v1477_v23  ;;  %v1478_v34 = vadd.f32 %v1462_v33, %v1426_v9  ;;  %v1515_v37 = vmax.f32 %v1499_v32, 0.0 }
 0x131   : > { %v1502_v8 = vadd.f32 %v2768_v0, %v1479_v3 }
 0x132   : > { %v1516_v38 = vmax.f32 %v1500_v10, 0.0  ;;  %v1501_v36 = vadd.f32 %v2768_v0, %v1478_v34  ;;  %v1236_v27 = vld [vmem:[#allocation3 + $0x28] sm:$0xff] }
 0x133   : > { %v1518_v40 = vmax.f32 %v1502_v8, 0.0  ;;  %v1288_v24 = vld [vmem:[#allocation3 + $0x29] sm:$0xff]  ;;  %v1256_v16 = vmul.f32 %v2719_v21, %v1236_v27 }
 0x134   : > { %v1531_v2 = vpack.c.bf16 %v1516_v38, %v1515_v37  ;;  %v1517_v41 = vmax.f32 %v1501_v36, 0.0  ;;  %v1308_v61 = vmul.f32 %v2723_v22, %v1288_v24  ;;  %v1239_v11 = vld [vmem:[#allocation3 + $0x40] sm:$0xff] }
 0x135   : > { %v1291_v25 = vld [vmem:[#allocation3 + $0x41] sm:$0xff]  ;;  %v1237_v28 = vld [vmem:[#allocation3 + $0x30] sm:$0xff]  ;;  %v1259_v44 = vmul.f32 %v2719_v21, %v1239_v11  ;;  %v1238_v52 = vld [vmem:[#allocation3 + $0x38] sm:$0xff] }
 0x136   : > { %2094 = vmatprep.mubr.bf16.mxu1 %v1531_v2  ;;  %v1289_v43 = vld [vmem:[#allocation3 + $0x31] sm:$0xff]  ;;  %v1311_v45 = vmul.f32 %v2723_v22, %v1291_v25  ;;  %v1532_v46 = vpack.c.bf16 %v1518_v40, %v1517_v41  ;;  %v1257_v35 = vmul.f32 %v2719_v21, %v1237_v28  ;;  %v1324_v42 = vadd.f32 %v1308_v61, %v1256_v16  ;;  %v1290_v53 = vld [vmem:[#allocation3 + $0x39] sm:$0xff]  ;;  %v1395_v19 = vld [vmem:[#allocation3 + $0x43] sm:$0xff] }
 0x137   : > { %v1392_v39 = vld [vmem:[#allocation3 + $0x2b] sm:$0xff]  ;;  %v1309_v17 = vmul.f32 %v2723_v22, %v1289_v43  ;;  %v1393_v62 = vld [vmem:[#allocation3 + $0x33] sm:$0xff]  ;;  %v1258_v63 = vmul.f32 %v2719_v21, %v1238_v52  ;;  %v1310_v49 = vmul.f32 %v2723_v22, %v1290_v53  ;;  %v1394_v20 = vld [vmem:[#allocation3 + $0x3b] sm:$0xff]  ;;  %v1415_v34 = vmul.f32 %v2731_v1, %v1395_v19 }
 0x138   : > { %v1412_v48 = vmul.f32 %v2731_v1, %v1392_v39  ;;  %v1444_v51 = vld [vmem:[#allocation3 + $0x2c] sm:$0xff]  ;;  %2095 = vmatmul.mubr.bf16.vlgmr.msra.gmra.mrb[0].mxu1 %v1532_v46  ;;  %v1376_v59 = vadd.f32 %v1360_v56, %v1324_v42  ;;  %v1413_v29 = vmul.f32 %v2731_v1, %v1393_v62  ;;  %v1445_v50 = vld [vmem:[#allocation3 + $0x34] sm:$0xff]  ;;  %v1327_v6 = vadd.f32 %v1311_v45, %v1259_v44  ;;  %v1447_v33 = vld [vmem:[#allocation3 + $0x44] sm:$0xff] }
 0x139   : > { %v1325_v5 = vadd.f32 %v1309_v17, %v1257_v35  ;;  %v1464_v32 = vmul.f32 %v2735_v55, %v1444_v51  ;;  %v1326_v9 = vadd.f32 %v1310_v49, %v1258_v63  ;;  %v1414_v10 = vmul.f32 %v2731_v1, %v1394_v20  ;;  %v1446_v2 = vld [vmem:[#allocation3 + $0x3c] sm:$0xff] }
 0x13a   : > { %v1428_v23 = vadd.f32 %v1412_v48, %v1376_v59  ;;  %v1379_v3 = vadd.f32 %v1363_v15, %v1327_v6  ;;  %v1465_v38 = vmul.f32 %v2735_v55, %v1445_v50  ;;  %v1467_v16 = vmul.f32 %v2735_v55, %v1447_v33 }
 0x13b   : > { %v1377_v30 = vadd.f32 %v1361_v54, %v1325_v5  ;;  %v1378_v40 = vadd.f32 %v1362_v7, %v1326_v9  ;;  %v1466_v45 = vmul.f32 %v2735_v55, %v1446_v2 }
 0x13c   : > { %v2072_v8 = vpop.f32.mrb[8].mxu0  ;;  %v1480_v36 = vadd.f32 %v1464_v32, %v1428_v23  ;;  %v1431_v41 = vadd.f32 %v1415_v34, %v1379_v3 }
 0x13d   : > { %v1429_v37 = vadd.f32 %v1413_v29, %v1377_v30  ;;  %v1169_v27 = vadd.f32 %v2072_v8, %v2696_v57  ;;  %v1160_v24 = vpop.f32.mrb[9].mxu0  ;;  %v1430_v43 = vadd.f32 %v1414_v10, %v1378_v40 }
 0x13e   : > { %v1161_v61 = vadd.f32 %v2696_v57, %v1160_v24  ;;  %v2073_v11 = vpop.f32.mrb[10].mxu0  ;;  %v1503_v28 = vadd.f32 %v2768_v0, %v1480_v36  ;;  %v1483_v46 = vadd.f32 %v1467_v16, %v1431_v41 }
 0x13f   : > { %v1481_v25 = vadd.f32 %v1465_v38, %v1429_v37  ;;  %v2812_v56 = vmax.f32 %v1169_v27, 0.0  ;;  %v1172_v39 = vadd.f32 %v2073_v11, %v2696_v57  ;;  %v1163_v44 = vpop.f32.mrb[11].mxu0  ;;  %v1482_v54 = vadd.f32 %v1466_v45, %v1430_v43 }
 0x140   : > { %v2816_v35 = vmax.f32 %v1161_v61, 0.0  ;;  %v1164_v17 = vadd.f32 %v2696_v57, %v1163_v44  ;;  %v1506_v48 = vadd.f32 %v2768_v0, %v1483_v46  ;;  %v1519_v52 = vmax.f32 %v1503_v28, 0.0 }
 0x141   : > { %v1504_v42 = vadd.f32 %v2768_v0, %v1481_v25  ;;  %1225 = vst [vmem:[#allocation3 + $0x62] sm:$0xff] %v2812_v56  ;;  %v2821_v62 = vmax.f32 %v1172_v39, 0.0  ;;  %v1505_v5 = vadd.f32 %v2768_v0, %v1482_v54  ;;  %v1366_v46 = vmul.f32 %v2727_v26, %v2812_v56 }
 0x142   : > { %1223 = vst [vmem:[#allocation3 + $0x52] sm:$0xff] %v2816_v35  ;;  %v2825_v51 = vmax.f32 %v1164_v17, 0.0  ;;  %v1522_v59 = vmax.f32 %v1506_v48, 0.0  ;;  %v1364_v8 = vmul.f32 %v2727_v26, %v2816_v35 }
 0x143   : > { %v1520_v53 = vmax.f32 %v1504_v42, 0.0  ;;  %1226 = vst [vmem:[#allocation3 + $0x6a] sm:$0xff] %v2821_v62  ;;  %v1521_v49 = vmax.f32 %v1505_v5, 0.0  ;;  %v1367_v41 = vmul.f32 %v2727_v26, %v2821_v62 }
 0x144   : > { %1224 = vst [vmem:[#allocation3 + $0x5a] sm:$0xff] %v2825_v51  ;;  %v1365_v36 = vmul.f32 %v2727_v26, %v2825_v51 }
 0x145   : > { %v1533_v63 = vpack.c.bf16 %v1520_v53, %v1519_v52  ;;  %v1534_v20 = vpack.c.bf16 %v1522_v59, %v1521_v49 }
 0x147   : > { %2098 = vmatprep.mubr.bf16.mxu1 %v1533_v63 }
 0x148   : > { %2099 = vmatmul.mubr.bf16.gmra.mrb[4].mxu1 %v1534_v20 }
 0x149   : > { %v1240_v19 = vld [vmem:[#allocation3 + $0x50] sm:$0xff] }
 0x14a   : > { %v1292_v29 = vld [vmem:[#allocation3 + $0x51] sm:$0xff]  ;;  %v1260_v50 = vmul.f32 %v2719_v21, %v1240_v19  ;;  %v1243_v7 = vld [vmem:[#allocation3 + $0x68] sm:$0xff] }
 0x14b   : > { %v1312_v6 = vmul.f32 %v2723_v22, %v1292_v29  ;;  %v1295_v15 = vld [vmem:[#allocation3 + $0x69] sm:$0xff]  ;;  %v1241_v30 = vld [vmem:[#allocation3 + $0x58] sm:$0xff]  ;;  %v1263_v9 = vmul.f32 %v2719_v21, %v1243_v7  ;;  %v1242_v2 = vld [vmem:[#allocation3 + $0x60] sm:$0xff] }
 0x14c   : > { %v1293_v23 = vld [vmem:[#allocation3 + $0x59] sm:$0xff]  ;;  %v1315_v33 = vmul.f32 %v2723_v22, %v1295_v15  ;;  %v1261_v3 = vmul.f32 %v2719_v21, %v1241_v30  ;;  %v1294_v27 = vld [vmem:[#allocation3 + $0x61] sm:$0xff]  ;;  %v1399_v16 = vld [vmem:[#allocation3 + $0x6b] sm:$0xff]  ;;  %v1262_v25 = vmul.f32 %v2719_v21, %v1242_v2 }
 0x14d   : > { %v1396_v32 = vld [vmem:[#allocation3 + $0x53] sm:$0xff]  ;;  %v1313_v10 = vmul.f32 %v2723_v22, %v1293_v23  ;;  %v1328_v34 = vadd.f32 %v1312_v6, %v1260_v50  ;;  %v1397_v37 = vld [vmem:[#allocation3 + $0x5b] sm:$0xff]  ;;  %v1314_v28 = vmul.f32 %v2723_v22, %v1294_v27  ;;  %v1398_v43 = vld [vmem:[#allocation3 + $0x63] sm:$0xff]  ;;  %v1419_v42 = vmul.f32 %v2731_v1, %v1399_v16 }
 0x14e   : > { %v1448_v38 = vld [vmem:[#allocation3 + $0x54] sm:$0xff]  ;;  %v1416_v40 = vmul.f32 %v2731_v1, %v1396_v32  ;;  %v1331_v24 = vadd.f32 %v1315_v33, %v1263_v9  ;;  %v1451_v39 = vld [vmem:[#allocation3 + $0x6c] sm:$0xff]  ;;  %v1417_v44 = vmul.f32 %v2731_v1, %v1397_v37  ;;  %v1449_v45 = vld [vmem:[#allocation3 + $0x5c] sm:$0xff]  ;;  %v1418_v5 = vmul.f32 %v2731_v1, %v1398_v43 }
 0x14f   : > { %v1329_v61 = vadd.f32 %v1313_v10, %v1261_v3  ;;  %v1380_v11 = vadd.f32 %v1364_v8, %v1328_v34  ;;  %v1468_v52 = vmul.f32 %v2735_v55, %v1448_v38  ;;  %v1330_v53 = vadd.f32 %v1314_v28, %v1262_v25  ;;  %v2076_v49 = vpop.f32.mrb[12].mxu0  ;;  %v1450_v6 = vld [vmem:[#allocation3 + $0x64] sm:$0xff] }
 0x150   : > { %v1383_v17 = vadd.f32 %v1367_v41, %v1331_v24  ;;  %v1471_v63 = vmul.f32 %v2735_v55, %v1451_v39  ;;  %v1469_v19 = vmul.f32 %v2735_v55, %v1449_v45  ;;  %v1185_v7 = vadd.f32 %v2076_v49, %v2696_v57  ;;  %v1176_v15 = vpop.f32.mrb[13].mxu0 }
 0x151   : > { %v1381_v54 = vadd.f32 %v1365_v36, %v1329_v61  ;;  %v1432_v48 = vadd.f32 %v1416_v40, %v1380_v11  ;;  %v1382_v50 = vadd.f32 %v1366_v46, %v1330_v53  ;;  %v1177_v23 = vadd.f32 %v2696_v57, %v1176_v15  ;;  %v2077_v32 = vpop.f32.mrb[14].mxu0 }
 0x152   : > { %v1435_v59 = vadd.f32 %v1419_v42, %v1383_v17  ;;  %v2856_v10 = vmax.f32 %v1185_v7, 0.0  ;;  %v1188_v34 = vadd.f32 %v2077_v32, %v2696_v57  ;;  %v1179_v8 = vpop.f32.mrb[15].mxu0  ;;  %v1470_v37 = vmul.f32 %v2735_v55, %v1450_v6 }
 0x153   : > { %v1433_v20 = vadd.f32 %v1417_v44, %v1381_v54  ;;  %v1484_v29 = vadd.f32 %v1468_v52, %v1432_v48  ;;  %v1434_v3 = vadd.f32 %v1418_v5, %v1382_v50  ;;  %v2861_v36 = vmax.f32 %v1177_v23, 0.0 }
 0x154   : > { %v1487_v30 = vadd.f32 %v1471_v63, %v1435_v59  ;;  %v1180_v40 = vadd.f32 %v2696_v57, %v1179_v8  ;;  %1229 = vst [vmem:[#allocation3 + $0x8a] sm:$0xff] %v2856_v10  ;;  %v2866_v27 = vmax.f32 %v1188_v34, 0.0 }
 0x155   : > { %v1485_v9 = vadd.f32 %v1469_v19, %v1433_v20  ;;  %v1507_v33 = vadd.f32 %v2768_v0, %v1484_v29  ;;  %v1486_v24 = vadd.f32 %v1470_v37, %v1434_v3  ;;  %1227 = vst [vmem:[#allocation3 + $0x7a] sm:$0xff] %v2861_v36  ;;  %v1368_v20 = vmul.f32 %v2727_v26, %v2861_v36 }
 0x156   : > { %v1510_v38 = vadd.f32 %v2768_v0, %v1487_v30  ;;  %v2869_v41 = vmax.f32 %v1180_v40, 0.0  ;;  %1230 = vst [vmem:[#allocation3 + $0x92] sm:$0xff] %v2866_v27  ;;  %v1371_v23 = vmul.f32 %v2727_v26, %v2866_v27 }
 0x157   : > { %v1508_v2 = vadd.f32 %v2768_v0, %v1485_v9  ;;  %v1523_v16 = vmax.f32 %v1507_v33, 0.0  ;;  %v1509_v11 = vadd.f32 %v2768_v0, %v1486_v24 }
 0x158   : > { %v1526_v25 = vmax.f32 %v1510_v38, 0.0  ;;  %1228 = vst [vmem:[#allocation3 + $0x82] sm:$0xff] %v2869_v41  ;;  %v1369_v50 = vmul.f32 %v2727_v26, %v2869_v41 }
 0x159   : > { %v1524_v61 = vmax.f32 %v1508_v2, 0.0  ;;  %v1525_v28 = vmax.f32 %v1509_v11, 0.0  ;;  %v1370_v2 = vmul.f32 %v2727_v26, %v2856_v10 }
 0x15b   : > { %v1535_v57 = vpack.c.bf16 %v1524_v61, %v1523_v16  ;;  %v1536_v43 = vpack.c.bf16 %v1526_v25, %v1525_v28 }
 0x15c   : > { %v1244_v39 = vld [vmem:[#allocation3 + $0x78] sm:$0xff] }
 0x15d   : > { %2102 = vmatprep.mubr.bf16.mxu1 %v1535_v57  ;;  %v1296_v44 = vld [vmem:[#allocation3 + $0x79] sm:$0xff]  ;;  %v1264_v45 = vmul.f32 %v2719_v21, %v1244_v39  ;;  %v1247_v17 = vld [vmem:[#allocation3 + $0x90] sm:$0xff] }
 0x15e   : > { %2103 = vmatmul.mubr.bf16.gmra.mrb[8].mxu1 %v1536_v43  ;;  %v1316_v46 = vmul.f32 %v2723_v22, %v1296_v44  ;;  %v1299_v42 = vld [vmem:[#allocation3 + $0x91] sm:$0xff]  ;;  %v1267_v53 = vmul.f32 %v2719_v21, %v1247_v17 }
 0x15f   : > { %v1245_v54 = vld [vmem:[#allocation3 + $0x80] sm:$0xff]  ;;  %v1319_v5 = vmul.f32 %v2723_v22, %v1299_v42  ;;  %v1246_v7 = vld [vmem:[#allocation3 + $0x88] sm:$0xff]  ;;  %v1403_v32 = vld [vmem:[#allocation3 + $0x93] sm:$0xff] }
 0x160   : > { %v1297_v48 = vld [vmem:[#allocation3 + $0x81] sm:$0xff]  ;;  %v1265_v59 = vmul.f32 %v2719_v21, %v1245_v54  ;;  %v1332_v49 = vadd.f32 %v1316_v46, %v1264_v45  ;;  %v1298_v15 = vld [vmem:[#allocation3 + $0x89] sm:$0xff]  ;;  %v1266_v3 = vmul.f32 %v2719_v21, %v1246_v7  ;;  %v1455_v37 = vld [vmem:[#allocation3 + $0x94] sm:$0xff]  ;;  %v1423_v16 = vmul.f32 %v2731_v1, %v1403_v32 }
 0x161   : > { %v1400_v52 = vld [vmem:[#allocation3 + $0x7b] sm:$0xff]  ;;  %v1317_v63 = vmul.f32 %v2723_v22, %v1297_v48  ;;  %v1401_v19 = vld [vmem:[#allocation3 + $0x83] sm:$0xff]  ;;  %v1335_v30 = vadd.f32 %v1319_v5, %v1267_v53  ;;  %v1318_v34 = vmul.f32 %v2723_v22, %v1298_v15  ;;  %v1402_v8 = vld [vmem:[#allocation3 + $0x8b] sm:$0xff]  ;;  %v1475_v43 = vmul.f32 %v2735_v55, %v1455_v37 }
 0x162   : > { %v1452_v29 = vld [vmem:[#allocation3 + $0x7c] sm:$0xff]  ;;  %v1420_v6 = vmul.f32 %v2731_v1, %v1400_v52  ;;  %v1384_v33 = vadd.f32 %v1368_v20, %v1332_v49  ;;  %v1421_v38 = vmul.f32 %v2731_v1, %v1401_v19  ;;  %v1453_v40 = vld [vmem:[#allocation3 + $0x84] sm:$0xff]  ;;  %v1422_v21 = vmul.f32 %v2731_v1, %v1402_v8  ;;  %v1454_v22 = vld [vmem:[#allocation3 + $0x8c] sm:$0xff] }
 0x163   : > { %v1333_v9 = vadd.f32 %v1317_v63, %v1265_v59  ;;  %v1387_v24 = vadd.f32 %v1371_v23, %v1335_v30  ;;  %v1472_v25 = vmul.f32 %v2735_v55, %v1452_v29  ;;  %v1334_v57 = vadd.f32 %v1318_v34, %v1266_v3  ;;  %v2185_v7 = vld [vmem:[%s3030_s9 + $0x20] sm:$0xff]   ;;  %v2186_v15 = vld [vmem:[%s3030_s9 + $0x28] sm:$0xff]   ;;  %v2187_v30 = vld [vmem:[%s3030_s9 + $0x30] sm:$0xff]  }
 0x164   : > { %v1436_v11 = vadd.f32 %v1420_v6, %v1384_v33  ;;  %v1473_v44 = vmul.f32 %v2735_v55, %v1453_v40  ;;  %v1474_v48 = vmul.f32 %v2735_v55, %v1454_v22  ;;  %v2182_v55 = vld [vmem:[%s3030_s9 + $0x8] sm:$0xff]   ;;  %v2184_v6 = vld [vmem:[%s3030_s9 + $0x18] sm:$0xff]   ;;  %v2937_v32 = vld [vmem:[%s3029_s8] ss:$0 sm:$0xff] }
 0x165   : > { %v1385_v61 = vadd.f32 %v1369_v50, %v1333_v9  ;;  %v1439_v28 = vadd.f32 %v1423_v16, %v1387_v24  ;;  %v1386_v46 = vadd.f32 %v1370_v2, %v1334_v57  ;;  %v2181_v50 = vld [vmem:[%s3030_s9] sm:$0xff]   ;;  %v2188_v23 = vld [vmem:[%s3030_s9 + $0x38] sm:$0xff]  }
 0x166   : > { %v1488_v45 = vadd.f32 %v1472_v25, %v1436_v11  ;;  %2111 = vmatpush3.bf16.msra.mxu0 %v2181_v50 }
 0x167   : > { %v1437_v39 = vadd.f32 %v1421_v38, %v1385_v61  ;;  %v1491_v26 = vadd.f32 %v1475_v43, %v1439_v28  ;;  %v1438_v54 = vadd.f32 %v1422_v21, %v1386_v46  ;;  %2112 = vmatprep.subr.bf16.mxu0 %v2253_v4 }
 0x168   : > { %v1511_v42 = vadd.f32 %v2768_v0, %v1488_v45 }
 0x169   : > { %v1489_v17 = vadd.f32 %v1473_v44, %v1437_v39  ;;  %v1514_v52 = vadd.f32 %v2768_v0, %v1491_v26  ;;  %v1490_v53 = vadd.f32 %v1474_v48, %v1438_v54 }
 0x16a   : > { %v1527_v5 = vmax.f32 %v1511_v42, 0.0  ;;  %2113 = vmatpush3.bf16.msra.mxu0 %v2182_v55 }
 0x16b   : > { %v1512_v1 = vadd.f32 %v2768_v0, %v1489_v17  ;;  %v1513_v63 = vadd.f32 %v2768_v0, %v1490_v53  ;;  %v1530_v49 = vmax.f32 %v1514_v52, 0.0  ;;  %2114 = vmatprep.subr.bf16.mxu0 %v2253_v4  ;;  %v2183_v0 = vld [vmem:[%s3030_s9 + $0x10] sm:$0xff]  }
 0x16d   : > { %v1528_v59 = vmax.f32 %v1512_v1, 0.0  ;;  %v1529_v19 = vmax.f32 %v1513_v63, 0.0 }
 0x16e   : > { %2115 = vmatpush3.bf16.msra.mxu0 %v2183_v0 }
 0x16f   : > { %v1537_v20 = vpack.c.bf16 %v1528_v59, %v1527_v5  ;;  %v1538_v29 = vpack.c.bf16 %v1530_v49, %v1529_v19  ;;  %2116 = vmatprep.subr.bf16.mxu0 %v2253_v4 }
 0x171   : > { %2106 = vmatprep.mubr.bf16.mxu1 %v1537_v20 }
 0x172   : > { %2107 = vmatmul.mubr.bf16.gmra.mrb[12].mxu1 %v1538_v29  ;;  %2117 = vmatpush3.bf16.msra.mxu0 %v2184_v6 }
 0x173   : > { %2118 = vmatprep.subr.bf16.mxu0 %v2253_v4 }
 0x176   : > { %2119 = vmatpush3.bf16.msra.mxu0 %v2185_v7 }
 0x177   : > { %2120 = vmatprep.subr.bf16.mxu0 %v2253_v4 }
 0x17a   : > { %2121 = vmatpush3.bf16.msra.mxu0 %v2186_v15 }
 0x17b   : > { %2122 = vmatprep.subr.bf16.mxu0 %v2253_v4 }
 0x17e   : > { %2123 = vmatpush3.bf16.msra.mxu0 %v2187_v30 }
 0x17f   : > { %2124 = vmatprep.subr.bf16.mxu0 %v2253_v4 }
 0x182   : > { %2125 = vmatpush3.bf16.msra.mxu0 %v2188_v23 }
 0x20b   : > { %v2096_v9 = vpop.f32.mrb[0].mxu1 }
 0x20c   : > { %v1644_v33 = vpop.f32.mrb[1].mxu1  ;;  %v1653_v3 = vadd.f32 %v2096_v9, %v2937_v32 }
 0x20d   : > { %v1645_v34 = vadd.f32 %v2937_v32, %v1644_v33  ;;  %v2097_v8 = vpop.f32.mrb[2].mxu1 }
 0x20e   : > { %v1647_v37 = vpop.f32.mrb[3].mxu1  ;;  %v1656_v40 = vadd.f32 %v2097_v8, %v2937_v32  ;;  %v1709_v4 = vmax.f32 %v1653_v3, 0.0 }
 0x20f   : > { %v1707_v38 = vmax.f32 %v1645_v34, 0.0  ;;  %v1648_v2 = vadd.f32 %v2937_v32, %v1647_v37 }
 0x210   : > { %v1710_v61 = vmax.f32 %v1656_v40, 0.0  ;;  %v1725_v25 = vadd.f32 %v1709_v4, %v2700_v12 }
 0x211   : > { %v1708_v24 = vmax.f32 %v1648_v2, 0.0  ;;  %v1723_v16 = vadd.f32 %v1707_v38, %v2703_v31 }
 0x212   : > { %v1726_v21 = vadd.f32 %v1710_v61, %v2707_v13 }
 0x213   : > { %v1724_v11 = vadd.f32 %v1708_v24, %v2710_v18 }
 0x215   : > { %v1739_v57 = vmax.f32 %v1723_v16, %v1724_v11 }
 0x217   : > { %v1740_v28 = vmax.f32 %v1739_v57, %v1725_v25 }
 0x219   : > { %v1741_v22 = vmax.f32 %v1740_v28, %v1726_v21 }
 0x21b   : > { %v2100_v43 = vpop.f32.mrb[4].mxu1  ;;  %v1742_v39 = vrot.slane %v1741_v22, 4 }
 0x21c   : > { %v1660_v44 = vpop.f32.mrb[5].mxu1  ;;  %v1669_v45 = vadd.f32 %v2100_v43, %v2937_v32 }
 0x21d   : > { %v1661_v46 = vadd.f32 %v2937_v32, %v1660_v44  ;;  %v2101_v26 = vpop.f32.mrb[6].mxu1  ;;  %v1743_v12 = vmax.f32 %v1741_v22, %v1742_v39 }
 0x21e   : > { %v1663_v17 = vpop.f32.mrb[7].mxu1  ;;  %v1672_v42 = vadd.f32 %v2101_v26, %v2937_v32  ;;  %v1713_v54 = vmax.f32 %v1669_v45, 0.0 }
 0x21f   : > { %v1711_v31 = vmax.f32 %v1661_v46, 0.0  ;;  %v1664_v18 = vadd.f32 %v2937_v32, %v1663_v17  ;;  %v1744_v53 = vrot.slane %v1743_v12, 2 }
 0x220   : > { %v1714_v52 = vmax.f32 %v1672_v42, 0.0  ;;  %v1729_v5 = vadd.f32 %v1713_v54, %v2759_v47 }
 0x221   : > { %v1712_v48 = vmax.f32 %v1664_v18, 0.0  ;;  %v1727_v13 = vadd.f32 %v1711_v31, %v2762_v60  ;;  %v1745_v20 = vmax.f32 %v1743_v12, %v1744_v53 }
 0x222   : > { %v1730_v63 = vadd.f32 %v1714_v52, %v2771_v58 }
 0x223   : > { %v1728_v1 = vadd.f32 %v1712_v48, %v2775_v14  ;;  %v1746_v50 = vrot.slane %v1745_v20, 1 }
 0x225   : > { %v1748_v59 = vmax.f32 %v1727_v13, %v1728_v1  ;;  %v1747_v6 = vmax.f32 %v1745_v20, %v1746_v50 }
 0x227   : > { %v1749_v49 = vmax.f32 %v1748_v59, %v1729_v5  ;;  %v1775_v9 = vpack.c.bf16 %v1747_v6, %v1747_v6 }
 0x229   : > { %v1750_v19 = vmax.f32 %v1749_v49, %v1730_v63  ;;  %v1806_v2 = vunpack.c.l.b16 %v1775_v9 }
 0x22b   : > { %v1751_v29 = vrot.slane %v1750_v19, 4 }
 0x22d   : > { %v1752_v55 = vmax.f32 %v1750_v19, %v1751_v29 }
 0x22f   : > { %v1753_v0 = vrot.slane %v1752_v55, 2 }
 0x231   : > { %v1754_v7 = vmax.f32 %v1752_v55, %v1753_v0  ;;  %v2104_v15 = vpop.f32.mrb[8].mxu1 }
 0x232   : > { %v1676_v60 = vpop.f32.mrb[9].mxu1  ;;  %v1685_v14 = vadd.f32 %v2104_v15, %v2937_v32 }
 0x233   : > { %v1755_v30 = vrot.slane %v1754_v7, 1  ;;  %v1677_v23 = vadd.f32 %v2937_v32, %v1676_v60  ;;  %v2105_v47 = vpop.f32.mrb[10].mxu1 }
 0x234   : > { %v1679_v33 = vpop.f32.mrb[11].mxu1  ;;  %v1688_v34 = vadd.f32 %v2105_v47, %v2937_v32  ;;  %v1717_v38 = vmax.f32 %v1685_v14, 0.0 }
 0x235   : > { %v1756_v58 = vmax.f32 %v1754_v7, %v1755_v30  ;;  %v1715_v3 = vmax.f32 %v1677_v23, 0.0  ;;  %v1680_v8 = vadd.f32 %v2937_v32, %v1679_v33 }
 0x236   : > { %v1718_v16 = vmax.f32 %v1688_v34, 0.0  ;;  %v1733_v11 = vadd.f32 %v1717_v38, %v2812_v56 }
 0x237   : > { %v1776_v37 = vpack.c.bf16 %v1756_v58, %v1756_v58  ;;  %v1716_v40 = vmax.f32 %v1680_v8, 0.0  ;;  %v1731_v24 = vadd.f32 %v1715_v3, %v2816_v35 }
 0x238   : > { %v1734_v21 = vadd.f32 %v1718_v16, %v2821_v62 }
 0x239   : > { %v1807_v4 = vunpack.c.l.b16 %v1776_v37  ;;  %v1732_v61 = vadd.f32 %v1716_v40, %v2825_v51 }
 0x23b   : > { %v1757_v25 = vmax.f32 %v1731_v24, %v1732_v61  ;;  %v1811_v57 = vsel %vm1810_vm3, %v1807_v4, %v1806_v2 }
 0x23d   : > { %v1758_v28 = vmax.f32 %v1757_v25, %v1733_v11 }
 0x23f   : > { %v1759_v22 = vmax.f32 %v1758_v28, %v1734_v21 }
 0x241   : > { %v1760_v43 = vrot.slane %v1759_v22, 4 }
 0x243   : > { %v1761_v39 = vmax.f32 %v1759_v22, %v1760_v43 }
 0x245   : > { %v1762_v44 = vrot.slane %v1761_v39, 2  ;;  %v2108_v45 = vpop.f32.mrb[12].mxu1 }
 0x246   : > { %v1692_v26 = vpop.f32.mrb[13].mxu1  ;;  %v1701_v17 = vadd.f32 %v2108_v45, %v2937_v32 }
 0x247   : > { %v1763_v46 = vmax.f32 %v1761_v39, %v1762_v44  ;;  %v1693_v35 = vadd.f32 %v2937_v32, %v1692_v26  ;;  %v2109_v31 = vpop.f32.mrb[14].mxu1 }
 0x248   : > { %v1695_v42 = vpop.f32.mrb[15].mxu1  ;;  %v1704_v18 = vadd.f32 %v2109_v31, %v2937_v32  ;;  %v1721_v54 = vmax.f32 %v1701_v17, 0.0 }
 0x249   : > { %v1764_v51 = vrot.slane %v1763_v46, 1  ;;  %v1719_v56 = vmax.f32 %v1693_v35, 0.0  ;;  %v1696_v62 = vadd.f32 %v2937_v32, %v1695_v42 }
 0x24a   : > { %v1722_v1 = vmax.f32 %v1704_v18, 0.0  ;;  %v1737_v59 = vadd.f32 %v1721_v54, %v2856_v10  ;;  %v2009_v10 = vld [vmem:[%s3031_s10] ss:$0 sm:$0xff] }
 0x24b   : > { %v1765_v12 = vmax.f32 %v1763_v46, %v1764_v51  ;;  %v1720_v48 = vmax.f32 %v1696_v62, 0.0  ;;  %v1735_v52 = vadd.f32 %v1719_v56, %v2861_v36 }
 0x24c   : > { %v1738_v20 = vadd.f32 %v1722_v1, %v2866_v27 }
 0x24d   : > { %v1777_v13 = vpack.c.bf16 %v1765_v12, %v1765_v12  ;;  %v1736_v53 = vadd.f32 %v1720_v48, %v2869_v41 }
 0x24f   : > { %v1808_v5 = vunpack.c.l.b16 %v1777_v13  ;;  %v1766_v63 = vmax.f32 %v1735_v52, %v1736_v53 }
 0x251   : > { %v1813_v49 = vsel %vm1812_vm4, %v1808_v5, %v1811_v57  ;;  %v1767_v19 = vmax.f32 %v1766_v63, %v1737_v59 }
 0x253   : > { %v1768_v32 = vmax.f32 %v1767_v19, %v1738_v20 }
 0x255   : > { %v1769_v29 = vrot.slane %v1768_v32, 4 }
 0x257   : > { %v1770_v50 = vmax.f32 %v1768_v32, %v1769_v29 }
 0x259   : > { %v1771_v55 = vrot.slane %v1770_v50, 2 }
 0x25b   : > { %v1772_v0 = vmax.f32 %v1770_v50, %v1771_v55 }
 0x25d   : > { %v1773_v36 = vrot.slane %v1772_v0, 1 }
 0x25f   : > { %v1774_v6 = vmax.f32 %v1772_v0, %v1773_v36 }
 0x261   : > { %v1778_v7 = vpack.c.bf16 %v1774_v6, %v1774_v6 }
 0x263   : > { %v1809_v41 = vunpack.c.l.b16 %v1778_v7 }
 0x265   : > { %v1815_v15 = vsel %vm1814_vm5, %v1809_v41, %v1813_v49 }
 0x266   : > { %v1816_v60 = vpack.c.b16 %v1815_v15, %v1815_v15 }
 0x268   : > { %2127 = vmatmul.mubr.bf16.vlgmr.msra.gmra.mrb[16].mxu0 %v1816_v60 }
 0x33b   : > { %v1900_v27 = vpop.f32.mrb[16].mxu0 }
 0x33c   : > { %v1901_v30 = vadd.f32 %v2009_v10, %v1900_v27  ;;  %v2128_v14 = vpop.f32.mrb[17].mxu0 }
 0x33d   : > { %v1903_v23 = vpop.f32.mrb[18].mxu0 }
 0x33e   : > { %1906 = vst [vmem:[%s379_s24] sm:$0xf] %v1901_v30  ;;  %v2129_v47 = vpop.f32.mrb[19].mxu0 }
 0x33f   : > { %2202 = shalt.err (!%p2199_p3)
}
 0x340   : > { %s2203_s13 = scalar_lea.hbm %s2979_s12, 64  ;;  %s2207_s30 = scalar_lea.hbm %s3032_s11, 128 }
 0x341   : > { %p2204_p4 = scmp.ne.s32.totalorder %s2979_s12, %s2203_s13  ;;  %p2208_p9 = scmp.lt.u32.totalorder %s2979_s12, %s3032_s11 }
 0x342   : > { %p2209_p10 = scmp.lt.u32.totalorder %s2207_s30, %s2203_s13  ;;  %p2211_p12 = scmp.lt.u32.totalorder %s2203_s13, %s2979_s12 }
 0x343   : > { %p2205_p7 = pnand %p2204_p4, %p2354_p5 }
 0x344   : > { %p2210_p11 = por %p2209_p10, %p2208_p9 }
 0x345   : > { %p2206_p8 = pneg %p2205_p7 }
 0x346   : > { %p2212_p13 = por %p2211_p12, %p2210_p11 }
 0x348   : > { %p2213_p0 = pnand %p2212_p13, %p2206_p8 }
 0x34a   : > { %2216 = shalt.err (!%p2213_p0)
}
 0x34b   : > { %2130 = dma.vmem_to_hbm [thread:$0]  (%p2354_p5), %s2981_s25, 64, %s2979_s12, %s1908_s15  }
 0x34c PF: > { %p2136_p1 = scmp.ge.s32.totalorder %s2251_s20, 2  ;;  %s1933_s21 = sand.u32 1, %s2239_s17  }
 0x34d   : > { %s1934_s29 = scalar_lea.sflag [#allocation5], %s1933_s21 }
 0x34e   : > { %p2133_p2 = pnand %p2136_p1, %p2358_p6 }
 0x350   : > { %2234 = dma.done.wait (!%p2133_p2), %s1934_s29, 64  }
 0x351   : > { %2236 = vsyncadd (!%p2133_p2), %s1934_s29, 4294967232  ;;  %p21_p3 = scmp.ge.s32.totalorder %s2341_s23, 4   ;;  %s3035_s17 = smov %s2243_s18 }
 0x352   : > { %s3036_s18 = smov %s2247_s19  ;;  %s3037_s19 = smov %s2352_s26 }
 0x353   : > { %s3038_s20 = smov %s2341_s23  ;;  %23 = sbr.rel (!%p21_p3) target bundleno = 3 (0x3), region = 210 }
 0x35a   :  { %1939 = vsyncpa [#allocation5], 1 }
 0x35b   :  { %1941 = vsyncpa [#allocation5 + $0x1], 1 }

</bundles_post_ra>
